<compile_context>
chip_gen: v5e
topology: v5e:2x2
jax: 0.10.0
libtpu: 0.0.40
codegen_flags: <defaults>
</compile_context>

<pallas_src>
import jax
import jax.numpy as jnp
from jax.experimental import pallas as pl
from jax.experimental.pallas import tpu as pltpu

IN_DIM = 784
H1, H2, H3 = 500, 100, 10
H1_PAD, H2_PAD, H3_PAD = 512, 128, 128          # padded to multiples of 128 lanes
OUT_DIM = 2 * IN_DIM                             # after cat([m, m], dim=1)


def _round_up(n, m):
    return ((n + m - 1) // m) * m


def _pad_to(a, shape):
    pads = [(0, t - s) for s, t in zip(a.shape, shape)]
    return jnp.pad(a, pads)


def _net_kernel(x_ref, w1_ref, b1_ref, w2_ref, b2_ref, w3_ref, b3_ref, y_ref, o_ref):
    # fc1 + relu   (bf16 MXU inputs, f32 accumulation)
    h1 = jnp.dot(x_ref[...], w1_ref[...], preferred_element_type=jnp.float32)
    h1 = jnp.maximum(h1 + b1_ref[...], 0.0)
    # fc2 + relu
    h2 = jnp.dot(h1.astype(jnp.bfloat16), w2_ref[...], preferred_element_type=jnp.float32)
    h2 = jnp.maximum(h2 + b2_ref[...], 0.0)
    # fc3 + relu
    h3 = jnp.dot(h2.astype(jnp.bfloat16), w3_ref[...], preferred_element_type=jnp.float32)
    h3 = jnp.maximum(h3 + b3_ref[...], 0.0)
    # (x + x - x is an identity -> removed)
    # matmul with fixed matrix y -> (TB, 784)
    m = jnp.dot(h3.astype(jnp.bfloat16), y_ref[...], preferred_element_type=jnp.float32)
    # cat([m, m], dim=1): both halves written lane-aligned into a (TB, 2, 784) block
    o_ref[:, 0, :] = m
    o_ref[:, 1, :] = m


def prepare_params(params):
    """Zero-pad feature dims to 512/128/128 and cast matmul operands to bf16."""
    w1, b1, w2, b2, w3, b3, y_mat = params
    w1p = _pad_to(w1, (IN_DIM, H1_PAD)).astype(jnp.bfloat16)
    b1p = _pad_to(b1, (1, H1_PAD)).astype(jnp.float32)
    w2p = _pad_to(w2, (H1_PAD, H2_PAD)).astype(jnp.bfloat16)
    b2p = _pad_to(b2, (1, H2_PAD)).astype(jnp.float32)
    w3p = _pad_to(w3, (H2_PAD, H3_PAD)).astype(jnp.bfloat16)
    b3p = _pad_to(b3, (1, H3_PAD)).astype(jnp.float32)
    yp = _pad_to(y_mat, (H3_PAD, IN_DIM)).astype(jnp.bfloat16)
    return w1p, b1p, w2p, b2p, w3p, b3p, yp


def net_forward(x, params, *, tb_max=512):
    """x: (B, ...) -> (B, 1568) float32."""
    B = x.shape[0]
    x2d = x.reshape(B, -1).astype(jnp.float32)
    assert x2d.shape[1] == IN_DIM, f"expected flattened dim {IN_DIM}, got {x2d.shape[1]}"

    # Batch tile: multiple of 8 sublanes; 512 (multiple of 256) at large B, capped for
    # v7x's 64 MiB VMEM while still fine on v5e/v6e.
    TB = _round_up(B, 8) if B <= tb_max else tb_max
    B_pad = _round_up(B, TB)
    if B_pad != B:
        x2d = jnp.pad(x2d, ((0, B_pad - B), (0, 0)))
    x_bf = x2d.astype(jnp.bfloat16)

    w1p, b1p, w2p, b2p, w3p, b3p, yp = prepare_params(params)

    def full_spec(shape):
        return pl.BlockSpec(shape, lambda i: (0,) * len(shape))

    out = pl.pallas_call(
        _net_kernel,
        out_shape=jax.ShapeDtypeStruct((B_pad, 2, IN_DIM), jnp.float32),
        grid=(B_pad // TB,),
        in_specs=[
            pl.BlockSpec((TB, IN_DIM), lambda i: (i, 0)),      # x block
            full_spec((IN_DIM, H1_PAD)),                        # w1
            full_spec((1, H1_PAD)),                             # b1
            full_spec((H1_PAD, H2_PAD)),                        # w2
            full_spec((1, H2_PAD)),                             # b2
            full_spec((H2_PAD, H3_PAD)),                        # w3
            full_spec((1, H3_PAD)),                             # b3
            full_spec((H3_PAD, IN_DIM)),                        # y
        ],
        out_specs=pl.BlockSpec((TB, 2, IN_DIM), lambda i: (i, 0, 0)),
        compiler_params=pltpu.CompilerParams(
            dimension_semantics=("parallel",),
            vmem_limit_bytes=32 << 20,
        ),
    )(x_bf, w1p, b1p, w2p, b2p, w3p, b3p, yp)

    return out.reshape(B_pad, OUT_DIM)[:B]


def make_params(key):
    """Deterministic init; weights stored (in_features, out_features), f32, unpadded."""
    ks = jax.random.split(key, 7)
    w1 = jax.random.normal(ks[0], (IN_DIM, H1), jnp.float32) * 0.02
    b1 = jax.random.normal(ks[1], (1, H1), jnp.float32) * 0.02
    w2 = jax.random.normal(ks[2], (H1, H2), jnp.float32) * 0.02
    b2 = jax.random.normal(ks[3], (1, H2), jnp.float32) * 0.02
    w3 = jax.random.normal(ks[4], (H2, H3), jnp.float32) * 0.02
    b3 = jax.random.normal(ks[5], (1, H3), jnp.float32) * 0.02
    y_mat = jax.random.uniform(ks[6], (H3, IN_DIM), jnp.float32)  # see TODO(synk) above
    return (w1, b1, w2, b2, w3, b3, y_mat)


def reference_forward(x, params):
    """Plain-JAX f32 reference (unpadded) for correctness checking."""
    w1, b1, w2, b2, w3, b3, y_mat = params
    h = x.reshape(x.shape[0], -1).astype(jnp.float32)
    h = jnp.maximum(h @ w1 + b1, 0.0)
    h = jnp.maximum(h @ w2 + b2, 0.0)
    h = jnp.maximum(h @ w3 + b3, 0.0)
    m = h @ y_mat
    return jnp.concatenate([m, m], axis=1)


if __name__ == "__main__":
    key = jax.random.PRNGKey(0)
    k_params, k_x = jax.random.split(key)
    params = make_params(k_params)

    # MNIST-like input: (batch=8, 1, 28, 28) -> flatten -> (8, 784)
    x = jax.random.normal(k_x, (8, 1, 28, 28), jnp.float32)

    out = jax.block_until_ready(net_forward(x, params))
    ref = jax.block_until_ready(reference_forward(x, params))

    assert out.shape == (8, OUT_DIM), out.shape
    # bf16 MXU inputs vs f32 reference -> loosened tolerance
    assert jnp.allclose(out, ref, atol=2e-2, rtol=2e-2), "mismatch vs reference"
    print("KERNEL_OK")
</pallas_src>

<mosaic_0001>
module attributes {stable_mosaic.version = 11 : i64} {
  func.func @_net_kernel(%arg0: i32, %arg1: memref<8x784xbf16, #tpu.memory_space<vmem>>, %arg2: memref<784x512xbf16, #tpu.memory_space<vmem>>, %arg3: memref<1x512xf32, #tpu.memory_space<vmem>>, %arg4: memref<512x128xbf16, #tpu.memory_space<vmem>>, %arg5: memref<1x128xf32, #tpu.memory_space<vmem>>, %arg6: memref<128x128xbf16, #tpu.memory_space<vmem>>, %arg7: memref<1x128xf32, #tpu.memory_space<vmem>>, %arg8: memref<128x784xbf16, #tpu.memory_space<vmem>>, %arg9: memref<8x2x784xf32, #tpu.memory_space<vmem>>) attributes {dimension_semantics = [#tpu.dimension_semantics<parallel>], iteration_bounds = array<i64: 1>, scalar_prefetch = 0 : i64, scratch_operands = 0 : i64, tpu.core_type = #tpu.core_type<tc>, window_params = [{transform_indices = @transform_0, window_bounds = array<i64: 8, 784>}, {pipeline_mode = #tpu.pipeline_mode<synchronous>, transform_indices = @transform_1, window_bounds = array<i64: 784, 512>}, {pipeline_mode = #tpu.pipeline_mode<synchronous>, transform_indices = @transform_2, window_bounds = array<i64: 1, 512>}, {pipeline_mode = #tpu.pipeline_mode<synchronous>, transform_indices = @transform_3, window_bounds = array<i64: 512, 128>}, {pipeline_mode = #tpu.pipeline_mode<synchronous>, transform_indices = @transform_4, window_bounds = array<i64: 1, 128>}, {pipeline_mode = #tpu.pipeline_mode<synchronous>, transform_indices = @transform_5, window_bounds = array<i64: 128, 128>}, {pipeline_mode = #tpu.pipeline_mode<synchronous>, transform_indices = @transform_6, window_bounds = array<i64: 1, 128>}, {pipeline_mode = #tpu.pipeline_mode<synchronous>, transform_indices = @transform_7, window_bounds = array<i64: 128, 784>}, {transform_indices = @transform_8, window_bounds = array<i64: 8, 2, 784>}]} {
    %c0 = arith.constant 0 : index
    %c0_0 = arith.constant 0 : index
    %0 = vector.load %arg1[%c0, %c0_0] : memref<8x784xbf16, #tpu.memory_space<vmem>>, vector<8x784xbf16>
    %c0_1 = arith.constant 0 : index
    %c0_2 = arith.constant 0 : index
    %1 = vector.load %arg2[%c0_1, %c0_2] : memref<784x512xbf16, #tpu.memory_space<vmem>>, vector<784x512xbf16>
    %cst = arith.constant dense<0.000000e+00> : vector<8x512xf32>
    %2 = tpu.matmul %0, %1, %cst {dimension_numbers = #tpu.dot_dimension_numbers<[1], [0], [0], [1], [0, 0, 1, 1], [], []>} : vector<8x784xbf16>, vector<784x512xbf16>, vector<8x512xf32> -> vector<8x512xf32>
    %c0_3 = arith.constant 0 : index
    %c0_4 = arith.constant 0 : index
    %3 = vector.load %arg3[%c0_3, %c0_4] : memref<1x512xf32, #tpu.memory_space<vmem>>, vector<1x512xf32>
    %4 = vector.broadcast %3 : vector<1x512xf32> to vector<8x512xf32>
    %5 = arith.addf %2, %4 : vector<8x512xf32>
    %cst_5 = arith.constant 0.000000e+00 : f32
    %6 = vector.broadcast %cst_5 : f32 to vector<8x512xf32>
    %7 = arith.maximumf %5, %6 : vector<8x512xf32>
    %8 = arith.truncf %7 : vector<8x512xf32> to vector<8x512xbf16>
    %c0_6 = arith.constant 0 : index
    %c0_7 = arith.constant 0 : index
    %9 = vector.load %arg4[%c0_6, %c0_7] : memref<512x128xbf16, #tpu.memory_space<vmem>>, vector<512x128xbf16>
    %cst_8 = arith.constant dense<0.000000e+00> : vector<8x128xf32>
    %10 = tpu.matmul %8, %9, %cst_8 {dimension_numbers = #tpu.dot_dimension_numbers<[1], [0], [0], [1], [0, 0, 1, 1], [], []>} : vector<8x512xbf16>, vector<512x128xbf16>, vector<8x128xf32> -> vector<8x128xf32>
    %c0_9 = arith.constant 0 : index
    %c0_10 = arith.constant 0 : index
    %11 = vector.load %arg5[%c0_9, %c0_10] : memref<1x128xf32, #tpu.memory_space<vmem>>, vector<1x128xf32>
    %12 = vector.broadcast %11 : vector<1x128xf32> to vector<8x128xf32>
    %13 = arith.addf %10, %12 : vector<8x128xf32>
    %cst_11 = arith.constant 0.000000e+00 : f32
    %14 = vector.broadcast %cst_11 : f32 to vector<8x128xf32>
    %15 = arith.maximumf %13, %14 : vector<8x128xf32>
    %16 = arith.truncf %15 : vector<8x128xf32> to vector<8x128xbf16>
    %c0_12 = arith.constant 0 : index
    %c0_13 = arith.constant 0 : index
    %17 = vector.load %arg6[%c0_12, %c0_13] : memref<128x128xbf16, #tpu.memory_space<vmem>>, vector<128x128xbf16>
    %cst_14 = arith.constant dense<0.000000e+00> : vector<8x128xf32>
    %18 = tpu.matmul %16, %17, %cst_14 {dimension_numbers = #tpu.dot_dimension_numbers<[1], [0], [0], [1], [0, 0, 1, 1], [], []>} : vector<8x128xbf16>, vector<128x128xbf16>, vector<8x128xf32> -> vector<8x128xf32>
    %c0_15 = arith.constant 0 : index
    %c0_16 = arith.constant 0 : index
    %19 = vector.load %arg7[%c0_15, %c0_16] : memref<1x128xf32, #tpu.memory_space<vmem>>, vector<1x128xf32>
    %20 = vector.broadcast %19 : vector<1x128xf32> to vector<8x128xf32>
    %21 = arith.addf %18, %20 : vector<8x128xf32>
    %cst_17 = arith.constant 0.000000e+00 : f32
    %22 = vector.broadcast %cst_17 : f32 to vector<8x128xf32>
    %23 = arith.maximumf %21, %22 : vector<8x128xf32>
    %24 = arith.truncf %23 : vector<8x128xf32> to vector<8x128xbf16>
    %c0_18 = arith.constant 0 : index
    %c0_19 = arith.constant 0 : index
    %25 = vector.load %arg8[%c0_18, %c0_19] : memref<128x784xbf16, #tpu.memory_space<vmem>>, vector<128x784xbf16>
    %cst_20 = arith.constant dense<0.000000e+00> : vector<8x784xf32>
    %26 = tpu.matmul %24, %25, %cst_20 {dimension_numbers = #tpu.dot_dimension_numbers<[1], [0], [0], [1], [0, 0, 1, 1], [], []>} : vector<8x128xbf16>, vector<128x784xbf16>, vector<8x784xf32> -> vector<8x784xf32>
    %c0_21 = arith.constant 0 : index
    %c0_22 = arith.constant 0 : index
    %c0_23 = arith.constant 0 : index
    %27 = vector.load %arg9[%c0_21, %c0_22, %c0_23] : memref<8x2x784xf32, #tpu.memory_space<vmem>>, vector<8x1x784xf32>
    %28 = vector.shape_cast %27 : vector<8x1x784xf32> to vector<8x784xf32>
    %29 = vector.shape_cast %26 : vector<8x784xf32> to vector<8x1x784xf32>
    tpu.vector_store %arg9[%c0_21, %c0_22, %c0_23], %29 {strides = array<i32>} : memref<8x2x784xf32, #tpu.memory_space<vmem>>, vector<8x1x784xf32>,
    %c0_24 = arith.constant 0 : index
    %c1 = arith.constant 1 : index
    %c0_25 = arith.constant 0 : index
    %30 = vector.load %arg9[%c0_24, %c1, %c0_25] : memref<8x2x784xf32, #tpu.memory_space<vmem>>, vector<8x1x784xf32>
    %31 = vector.shape_cast %30 : vector<8x1x784xf32> to vector<8x784xf32>
    %32 = vector.shape_cast %26 : vector<8x784xf32> to vector<8x1x784xf32>
    tpu.vector_store %arg9[%c0_24, %c1, %c0_25], %32 {strides = array<i32>} : memref<8x2x784xf32, #tpu.memory_space<vmem>>, vector<8x1x784xf32>,
    return
  }
  func.func @transform_0(%arg0: i32) -> (i32, i32) {
    %c0_i32 = arith.constant 0 : i32
    %c0_i32_0 = arith.constant 0 : i32
    return %arg0, %c0_i32 : i32, i32
  }
  func.func @transform_1(%arg0: i32) -> (i32, i32) {
    %c0_i32 = arith.constant 0 : i32
    %c0_i32_0 = arith.constant 0 : i32
    %c0_i32_1 = arith.constant 0 : i32
    return %c0_i32, %c0_i32_0 : i32, i32
  }
  func.func @transform_2(%arg0: i32) -> (i32, i32) {
    %c0_i32 = arith.constant 0 : i32
    %c0_i32_0 = arith.constant 0 : i32
    %c0_i32_1 = arith.constant 0 : i32
    return %c0_i32, %c0_i32_0 : i32, i32
  }
  func.func @transform_3(%arg0: i32) -> (i32, i32) {
    %c0_i32 = arith.constant 0 : i32
    %c0_i32_0 = arith.constant 0 : i32
    %c0_i32_1 = arith.constant 0 : i32
    return %c0_i32, %c0_i32_0 : i32, i32
  }
  func.func @transform_4(%arg0: i32) -> (i32, i32) {
    %c0_i32 = arith.constant 0 : i32
    %c0_i32_0 = arith.constant 0 : i32
    %c0_i32_1 = arith.constant 0 : i32
    return %c0_i32, %c0_i32_0 : i32, i32
  }
  func.func @transform_5(%arg0: i32) -> (i32, i32) {
    %c0_i32 = arith.constant 0 : i32
    %c0_i32_0 = arith.constant 0 : i32
    %c0_i32_1 = arith.constant 0 : i32
    return %c0_i32, %c0_i32_0 : i32, i32
  }
  func.func @transform_6(%arg0: i32) -> (i32, i32) {
    %c0_i32 = arith.constant 0 : i32
    %c0_i32_0 = arith.constant 0 : i32
    %c0_i32_1 = arith.constant 0 : i32
    return %c0_i32, %c0_i32_0 : i32, i32
  }
  func.func @transform_7(%arg0: i32) -> (i32, i32) {
    %c0_i32 = arith.constant 0 : i32
    %c0_i32_0 = arith.constant 0 : i32
    %c0_i32_1 = arith.constant 0 : i32
    return %c0_i32, %c0_i32_0 : i32, i32
  }
  func.func @transform_8(%arg0: i32) -> (i32, i32, i32) {
    %c0_i32 = arith.constant 0 : i32
    %c0_i32_0 = arith.constant 0 : i32
    %c0_i32_1 = arith.constant 0 : i32
    return %arg0, %c0_i32, %c0_i32_0 : i32, i32, i32
  }
}

</mosaic_0001>

<bundles_post_ra>
// kernel: tpu_custom_call.1
= control target key start
LH: loop header
LB: loop body
LE: loop exit
PB: predicated region body
PF: predicated region fallthrough
CT: control target
= control target key end

     0   :  { %13 = vsyncpa [#allocation3], 0  ;;  %s4839_s0 = inlined_call_operand.vmem [shape: bf16[8,784], index: 0, kind: input, shape index: {}]   ;;  %s4840_s1 = inlined_call_operand.hbm [shape: bf16[784,512], index: 1, kind: input, shape index: {}]   ;;  %s4841_s2 = inlined_call_operand.vmem [shape: f32[1,512], index: 2, kind: input, shape index: {}]   ;;  %s4842_s3 = inlined_call_operand.vmem [shape: bf16[512,128], index: 3, kind: input, shape index: {}]   ;;  %s4843_s4 = inlined_call_operand.vmem [shape: f32[1,128], index: 4, kind: input, shape index: {}]   ;;  %s4844_s5 = inlined_call_operand.vmem [shape: bf16[128,128], index: 5, kind: input, shape index: {}]   ;;  %s4845_s6 = inlined_call_operand.vmem [shape: f32[1,128], index: 6, kind: input, shape index: {}]   ;;  %s4846_s7 = inlined_call_operand.vmem [shape: bf16[128,784], index: 7, kind: input, shape index: {}]   ;;  %s4847_s8 = inlined_call_operand.hbm [shape: f32[8,2,784], index: 8, kind: output, shape index: {}]  }
   0x1   :  { %14 = vsyncpa [#allocation4], 0  ;;  %s21_s29 = sshll.u32 %s4840_s1, 4  ;;  %s4151_s30 = smov [#allocation2]   ;;  %s22_s29 = int_to_ptr.hbm [resolvable:$true] %s21_s29 }
   0x2   :  { %s23_s9 = sshll.u32 %s4151_s30, 4  ;;  %s4152_s10 = smov 256   ;;  %s24_s9 = int_to_ptr.vmem [resolvable:$true] %s23_s9 }
   0x3   :  { %s4153_s11 = smov 16  }
   0x4   :  { %29 = dma.hbm_to_vmem [thread:$0]  %s22_s29, 25088, %s24_s9, [#allocation3], %s4152_s10, %s4152_s10, %s4153_s11  }
   0x5   :  { %4147 = dma.done.wait [#allocation3], 25088  }
   0x6   :  { %4148 = vsyncadd [#allocation3], 4294942208  ;;  %v2741_v0 = vld [vmem:[#allocation2 + $0xe0] sm:$0xf]  ;;  %v3829_v1 = vld [vmem:[#allocation2 + $0xec] sm:$0xf0] }
   0x7   :  { %v2869_v2 = vld [vmem:[#allocation2 + $0x1e0] sm:$0xf]  ;;  %v2742_v3 = vor.u32 %v3829_v1, %v2741_v0  ;;  %v3861_v4 = vld [vmem:[#allocation2 + $0x1ec] sm:$0xf0]  ;;  %vm1261_vm0 = vcmask 130048   ;;  %vm2490_vm1 = vcmask 1040384  }
   0x8   :  { %v2997_v5 = vld [vmem:[#allocation2 + $0x2e0] sm:$0xf]  ;;  %v3893_v6 = vld [vmem:[#allocation2 + $0x2ec] sm:$0xf0]  ;;  %v2870_v7 = vor.u32 %v3861_v4, %v2869_v2  ;;  %vm2502_vm4 = vcmask 1041409   ;;  %vm2504_vm5 = vcmask 1043459  }
   0x9   :  { %v2998_v8 = vor.u32 %v3893_v6, %v2997_v5  ;;  %v3125_v9 = vld [vmem:[#allocation2 + $0x3e0] sm:$0xf]  ;;  %v3925_v10 = vld [vmem:[#allocation2 + $0x3ec] sm:$0xf0]  ;;  %1265 = vmatpush.bf16.msra.mxu0 %v2742_v3  ;;  %vm2530_vm8 = vcmask 1046528   ;;  %vm2494_vm9 = vcmask 1041408  }
   0xa   :  { %v2725_v11 = vld [vmem:[#allocation2 + $0xc0] sm:$0xf]  ;;  %v3126_v12 = vor.u32 %v3925_v10, %v3125_v9  ;;  %v3825_v13 = vld [vmem:[#allocation2 + $0xcc] sm:$0xf0]  ;;  %1278 = vmatpush.bf16.msra.mxu1 %v2870_v7  ;;  %vm2506_vm11 = vcmask 1042433   ;;  %vm4849_vm13 = vcmask 1043458  }
   0xb   :  { %v2853_v14 = vld [vmem:[#allocation2 + $0x1c0] sm:$0xf]  ;;  %v3857_v15 = vld [vmem:[#allocation2 + $0x1cc] sm:$0xf0]  ;;  %1291 = vmatpush.bf16.msra.mxu2 %v2998_v8  ;;  %v2726_v16 = vor.u32 %v3825_v13, %v2725_v11  ;;  %vm4848_vm15 = vcmask 1044483   ;;  %vm4850_vm10 = vcmask 1042434  }
   0xc   :  { %v2854_v17 = vor.u32 %v3857_v15, %v2853_v14  ;;  %v2981_v18 = vld [vmem:[#allocation2 + $0x2c0] sm:$0xf]  ;;  %v3889_v19 = vld [vmem:[#allocation2 + $0x2cc] sm:$0xf0]  ;;  %1304 = vmatpush.bf16.msra.mxu3 %v3126_v12  ;;  %vm4851_vm14 = vcmask 1044484   ;;  %vm4852_vm12 = vmmov %vm4850_vm10  ;;  %vm4854_vm2 = vcmask 1045509  }
   0xd   :  { %v3109_v20 = vld [vmem:[#allocation2 + $0x3c0] sm:$0xf]  ;;  %v2982_v21 = vor.u32 %v3889_v19, %v2981_v18  ;;  %v3921_v22 = vld [vmem:[#allocation2 + $0x3cc] sm:$0xf0]  ;;  %1266 = vmatpush.bf16.msra.mxu0 %v2726_v16  ;;  %vm4853_vm3 = vmmov %vm4851_vm14  ;;  %vm4855_vm7 = vcmask 1046534   ;;  %s2614_s28 = sshll.u32 %s4847_s8, 4  ;;  %s2615_s28 = int_to_ptr.hbm [resolvable:$true] %s2614_s28 }
   0xe   :  { %v2709_v23 = vld [vmem:[#allocation2 + $0xa0] sm:$0xf]  ;;  %v3821_v24 = vld [vmem:[#allocation2 + $0xac] sm:$0xf0]  ;;  %v3110_v25 = vor.u32 %v3921_v22, %v3109_v20  ;;  %1279 = vmatpush.bf16.msra.mxu1 %v2854_v17  ;;  %vm4856_vm6 = vmmov %vm4854_vm2  ;;  %s4155_s8 = smov 224   ;;  %s4156_s29 = smov 14  }
   0xf   :  { %v2837_v26 = vld [vmem:[#allocation2 + $0x1a0] sm:$0xf]  ;;  %v3853_v27 = vld [vmem:[#allocation2 + $0x1ac] sm:$0xf0]  ;;  %v2710_v29 = vor.u32 %v3821_v24, %v2709_v23  ;;  %1292 = vmatpush.bf16.msra.mxu2 %v2982_v21 }
  0x10   :  { %v2965_v28 = vld [vmem:[#allocation2 + $0x2a0] sm:$0xf]  ;;  %v3885_v30 = vld [vmem:[#allocation2 + $0x2ac] sm:$0xf0]  ;;  %v2838_v33 = vor.u32 %v3853_v27, %v2837_v26  ;;  %1305 = vmatpush.bf16.msra.mxu3 %v3110_v25  ;;  %v48_v25 = vld [vmem:[%s4839_s0 + $0x8] sm:$0xff] }
  0x11   :  { %v3093_v31 = vld [vmem:[#allocation2 + $0x3a0] sm:$0xf]  ;;  %v3917_v32 = vld [vmem:[#allocation2 + $0x3ac] sm:$0xf0]  ;;  %v2966_v34 = vor.u32 %v3885_v30, %v2965_v28  ;;  %1267 = vmatpush.bf16.msra.mxu0 %v2710_v29 }
  0x12   :  { %v2693_v35 = vld [vmem:[#allocation2 + $0x80] sm:$0xf]  ;;  %v3817_v36 = vld [vmem:[#allocation2 + $0x8c] sm:$0xf0]  ;;  %v3094_v38 = vor.u32 %v3917_v32, %v3093_v31  ;;  %1280 = vmatpush.bf16.msra.mxu1 %v2838_v33 }
  0x13   :  { %v2821_v37 = vld [vmem:[#allocation2 + $0x180] sm:$0xf]  ;;  %v3849_v39 = vld [vmem:[#allocation2 + $0x18c] sm:$0xf0]  ;;  %v2694_v44 = vor.u32 %v3817_v36, %v2693_v35  ;;  %1293 = vmatpush.bf16.msra.mxu2 %v2966_v34  ;;  %v3827_v34 = vld [vmem:[#allocation2 + $0xe4] sm:$0xf]  ;;  %v263_v36 = vunpack.c.l.b16 %v48_v25 }
  0x14   :  { %v2949_v40 = vld [vmem:[#allocation2 + $0x280] sm:$0xf]  ;;  %v3881_v41 = vld [vmem:[#allocation2 + $0x28c] sm:$0xf0]  ;;  %v2822_v45 = vor.u32 %v3849_v39, %v2821_v37  ;;  %1306 = vmatpush.bf16.msra.mxu3 %v3094_v38  ;;  %v2743_v35 = vld [vmem:[#allocation2 + $0xf0] sm:$0xf0] }
  0x15   :  { %v3077_v42 = vld [vmem:[#allocation2 + $0x380] sm:$0xf]  ;;  %v3913_v43 = vld [vmem:[#allocation2 + $0x38c] sm:$0xf0]  ;;  %v2950_v46 = vor.u32 %v3881_v41, %v2949_v40  ;;  %1268 = vmatpush.bf16.msra.mxu0 %v2694_v44 }
  0x16   :  { %v2677_v47 = vld [vmem:[#allocation2 + $0x60] sm:$0xf]  ;;  %v3813_v48 = vld [vmem:[#allocation2 + $0x6c] sm:$0xf0]  ;;  %v3078_v50 = vor.u32 %v3913_v43, %v3077_v42  ;;  %1281 = vmatpush.bf16.msra.mxu1 %v2822_v45  ;;  %v264_v42 = vunpack.c.h.b16 %v48_v25  ;;  %v3847_v25 = vld [vmem:[#allocation2 + $0x184] sm:$0xf] }
  0x17   :  { %v2805_v49 = vld [vmem:[#allocation2 + $0x160] sm:$0xf]  ;;  %v3845_v51 = vld [vmem:[#allocation2 + $0x16c] sm:$0xf0]  ;;  %v2678_v56 = vor.u32 %v3813_v48, %v2677_v47  ;;  %1294 = vmatpush.bf16.msra.mxu2 %v2950_v46  ;;  %v3859_v46 = vld [vmem:[#allocation2 + $0x1e4] sm:$0xf] }
  0x18   :  { %v2933_v52 = vld [vmem:[#allocation2 + $0x260] sm:$0xf]  ;;  %v3877_v53 = vld [vmem:[#allocation2 + $0x26c] sm:$0xf0]  ;;  %v2806_v57 = vor.u32 %v3845_v51, %v2805_v49  ;;  %1307 = vmatpush.bf16.msra.mxu3 %v3078_v50  ;;  %v2871_v47 = vld [vmem:[#allocation2 + $0x1f0] sm:$0xf0]  ;;  %v2746_v49 = vor.u32 %v3827_v34, %v2743_v35 }
  0x19   :  { %v3061_v54 = vld [vmem:[#allocation2 + $0x360] sm:$0xf]  ;;  %v3909_v55 = vld [vmem:[#allocation2 + $0x36c] sm:$0xf0]  ;;  %v2934_v58 = vor.u32 %v3877_v53, %v2933_v52  ;;  %1269 = vmatpush.bf16.msra.mxu0 %v2678_v56  ;;  %v4211_v53 = vpack.c.b16 %v263_v36, %v263_v36  ;;  %v2727_v56 = vld [vmem:[#allocation2 + $0xd0] sm:$0xf0] }
  0x1a   :  { %v2661_v59 = vld [vmem:[#allocation2 + $0x40] sm:$0xf]  ;;  %v3809_v60 = vld [vmem:[#allocation2 + $0x4c] sm:$0xf0]  ;;  %v3062_v62 = vor.u32 %v3909_v55, %v3061_v54  ;;  %1282 = vmatpush.bf16.msra.mxu1 %v2806_v57  ;;  %v3823_v55 = vld [vmem:[#allocation2 + $0xc4] sm:$0xf] }
  0x1b   :  { %v2789_v61 = vld [vmem:[#allocation2 + $0x140] sm:$0xf]  ;;  %v3841_v63 = vld [vmem:[#allocation2 + $0x14c] sm:$0xf0]  ;;  %v2662_v4 = vor.u32 %v3809_v60, %v2661_v59  ;;  %1295 = vmatpush.bf16.msra.mxu2 %v2934_v58  ;;  %v4215_v60 = vpack.c.b16 %v264_v42, %v264_v42  ;;  %v2679_v34 = vld [vmem:[#allocation2 + $0x70] sm:$0xf0] }
  0x1c   :  { %v2917_v0 = vld [vmem:[#allocation2 + $0x240] sm:$0xf]  ;;  %v3873_v1 = vld [vmem:[#allocation2 + $0x24c] sm:$0xf0]  ;;  %v2790_v5 = vor.u32 %v3841_v63, %v2789_v61  ;;  %1308 = vmatpush.bf16.msra.mxu3 %v3062_v62  ;;  %v2874_v61 = vor.u32 %v3859_v46, %v2871_v47  ;;  %v3855_v63 = vld [vmem:[#allocation2 + $0x1c4] sm:$0xf] }
  0x1d   :  { %v3045_v2 = vld [vmem:[#allocation2 + $0x340] sm:$0xf]  ;;  %v3905_v3 = vld [vmem:[#allocation2 + $0x34c] sm:$0xf0]  ;;  %v2918_v6 = vor.u32 %v3873_v1, %v2917_v0  ;;  %1270 = vmatpush.bf16.msra.mxu0 %v2662_v4  ;;  %v2855_v0 = vld [vmem:[#allocation2 + $0x1d0] sm:$0xf0] }
  0x1e   :  { %v2645_v7 = vld [vmem:[#allocation2 + $0x20] sm:$0xf]  ;;  %v3805_v8 = vld [vmem:[#allocation2 + $0x2c] sm:$0xf0]  ;;  %v3046_v10 = vor.u32 %v3905_v3, %v3045_v2  ;;  %1283 = vmatpush.bf16.msra.mxu1 %v2790_v5  ;;  %v2730_v2 = vor.u32 %v3823_v55, %v2727_v56  ;;  %v3807_v46 = vld [vmem:[#allocation2 + $0x44] sm:$0xf] }
  0x1f   :  { %v2773_v9 = vld [vmem:[#allocation2 + $0x120] sm:$0xf]  ;;  %v3837_v11 = vld [vmem:[#allocation2 + $0x12c] sm:$0xf0]  ;;  %v2646_v17 = vor.u32 %v3805_v8, %v2645_v7  ;;  %1296 = vmatpush.bf16.msra.mxu2 %v2918_v6  ;;  %v3819_v7 = vld [vmem:[#allocation2 + $0xa4] sm:$0xf] }
  0x20   :  { %v2901_v12 = vld [vmem:[#allocation2 + $0x220] sm:$0xf]  ;;  %v3869_v13 = vld [vmem:[#allocation2 + $0x22c] sm:$0xf0]  ;;  %v2774_v21 = vor.u32 %v3837_v11, %v2773_v9  ;;  %1309 = vmatpush.bf16.msra.mxu3 %v3046_v10  ;;  %v2711_v8 = vld [vmem:[#allocation2 + $0xb0] sm:$0xf0]  ;;  %v2858_v10 = vor.u32 %v3855_v63, %v2855_v0 }
  0x21   :  { %v3029_v14 = vld [vmem:[#allocation2 + $0x320] sm:$0xf]  ;;  %v3901_v15 = vld [vmem:[#allocation2 + $0x32c] sm:$0xf0]  ;;  %v2902_v22 = vor.u32 %v3869_v13, %v2901_v12  ;;  %1271 = vmatpush.bf16.msra.mxu0 %v2646_v17  ;;  %v3851_v12 = vld [vmem:[#allocation2 + $0x1a4] sm:$0xf] }
  0x22   :  { %v2629_v16 = vld [vmem:[#allocation2] sm:$0xf]  ;;  %v3801_v18 = vld [vmem:[#allocation2 + $0xc] sm:$0xf0]  ;;  %v3030_v26 = vor.u32 %v3901_v15, %v3029_v14  ;;  %1284 = vmatpush.bf16.msra.mxu1 %v2774_v21  ;;  %v2839_v13 = vld [vmem:[#allocation2 + $0x1b0] sm:$0xf0]  ;;  %v2714_v15 = vor.u32 %v3819_v7, %v2711_v8 }
  0x23   :  { %v2757_v19 = vld [vmem:[#allocation2 + $0x100] sm:$0xf]  ;;  %v3833_v20 = vld [vmem:[#allocation2 + $0x10c] sm:$0xf0]  ;;  %v2630_v33 = vor.u32 %v3801_v18, %v2629_v16  ;;  %1297 = vmatpush.bf16.msra.mxu2 %v2902_v22  ;;  %v2695_v21 = vld [vmem:[#allocation2 + $0x90] sm:$0xf0] }
  0x24   :  { %v2885_v23 = vld [vmem:[#allocation2 + $0x200] sm:$0xf]  ;;  %v3865_v24 = vld [vmem:[#allocation2 + $0x20c] sm:$0xf0]  ;;  %v2758_v38 = vor.u32 %v3833_v20, %v2757_v19  ;;  %1310 = vmatpush.bf16.msra.mxu3 %v3030_v26  ;;  %v3815_v20 = vld [vmem:[#allocation2 + $0x84] sm:$0xf] }
  0x25   :  { %v3013_v27 = vld [vmem:[#allocation2 + $0x300] sm:$0xf]  ;;  %v3897_v28 = vld [vmem:[#allocation2 + $0x30c] sm:$0xf0]  ;;  %v2886_v39 = vor.u32 %v3865_v24, %v2885_v23  ;;  %1272 = vmatpush.bf16.msra.mxu0 %v2630_v33  ;;  %v50_v22 = vld [vmem:[%s4839_s0 + $0x18] sm:$0xf]  ;;  %v2842_v23 = vor.u32 %v3851_v12, %v2839_v13 }
  0x26   :  { %v3253_v29 = vld [vmem:[#allocation2 + $0x4e0] sm:$0xf]  ;;  %v3957_v30 = vld [vmem:[#allocation2 + $0x4ec] sm:$0xf0]  ;;  %v3014_v43 = vor.u32 %v3897_v28, %v3013_v27  ;;  %1285 = vmatpush.bf16.msra.mxu1 %v2758_v38  ;;  %v2823_v26 = vld [vmem:[#allocation2 + $0x190] sm:$0xf0]  ;;  %v2698_v28 = vor.u32 %v3815_v20, %v2695_v21  ;;  %v267_v35 = vunpack.c.l.b16 %v50_v22 }
  0x27   :  { %v3381_v31 = vld [vmem:[#allocation2 + $0x5e0] sm:$0xf]  ;;  %v3989_v32 = vld [vmem:[#allocation2 + $0x5ec] sm:$0xf0]  ;;  %v3254_v44 = vor.u32 %v3957_v30, %v3253_v29  ;;  %1298 = vmatpush.bf16.msra.mxu2 %v2886_v39  ;;  %v3811_v33 = vld [vmem:[#allocation2 + $0x64] sm:$0xf]  ;;  %v2826_v36 = vor.u32 %v3847_v25, %v2823_v26 }
  0x28   :  { %v47_v37 = vld [vmem:[%s4839_s0] sm:$0xff]  ;;  %v3993_v45 = vld [vmem:[#allocation2 + $0x60c] sm:$0xf0]  ;;  %v3382_v48 = vor.u32 %v3989_v32, %v3381_v31  ;;  %1311 = vmatpush.bf16.msra.mxu3 %v3014_v43  ;;  %v2807_v39 = vld [vmem:[#allocation2 + $0x170] sm:$0xf0] }
  0x29   :  { %v3397_v40 = vld [vmem:[#allocation2 + $0x600] sm:$0xf]  ;;  %v261_v41 = vunpack.c.l.b16 %v47_v37  ;;  %v3953_v51 = vld [vmem:[#allocation2 + $0x4cc] sm:$0xf0]  ;;  %v262_v58 = vunpack.c.h.b16 %v47_v37  ;;  %1317 = vmatpush.bf16.msrb.mxu0 %v3254_v44  ;;  %v3843_v38 = vld [vmem:[#allocation2 + $0x164] sm:$0xf] }
  0x2a   :  { %v3237_v50 = vld [vmem:[#allocation2 + $0x4c0] sm:$0xf]  ;;  %v3985_v54 = vld [vmem:[#allocation2 + $0x5cc] sm:$0xf0]  ;;  %v3398_v59 = vor.u32 %v3993_v45, %v3397_v40  ;;  %1330 = vmatpush.bf16.msrb.mxu1 %v3382_v48  ;;  %1299 = vmatmul.bf16.vlgmr.msra.gmra.mxu2 %v4211_v53  ;;  %v2663_v47 = vld [vmem:[#allocation2 + $0x50] sm:$0xf0]  ;;  %v4226_v48 = vpack.c.b16 %v267_v35, %v267_v35 }
  0x2b   :  { %v3365_v52 = vld [vmem:[#allocation2 + $0x5c0] sm:$0xf]  ;;  %v4213_v57 = vpack.c.b16 %v261_v41, %v261_v41  ;;  %v3238_v62 = vor.u32 %v3953_v51, %v3237_v50  ;;  %v3949_v4 = vld [vmem:[#allocation2 + $0x4ac] sm:$0xf0]  ;;  %v4219_v9 = vpack.c.b16 %v262_v58, %v262_v58  ;;  %1312 = vmatmul.bf16.vlgmr.msra.gmra.mxu3 %v4215_v60  ;;  %v2682_v41 = vor.u32 %v3811_v33, %v2679_v34  ;;  %v3839_v51 = vld [vmem:[#allocation2 + $0x144] sm:$0xf] }
  0x2c   :  { %1356 = vmatpush.bf16.msrb.mxu3 %v2746_v49  ;;  %v3366_v1 = vor.u32 %v3985_v54, %v3365_v52  ;;  %v3221_v3 = vld [vmem:[#allocation2 + $0x4a0] sm:$0xf]  ;;  %v3981_v6 = vld [vmem:[#allocation2 + $0x5ac] sm:$0xf0]  ;;  %1350 = vmatpush.bf16.msrb.mxu2 %v3398_v59  ;;  %v2810_v49 = vor.u32 %v3843_v38, %v2807_v39  ;;  %v2791_v52 = vld [vmem:[#allocation2 + $0x150] sm:$0xf0]  ;;  %v2666_v55 = vor.u32 %v3807_v46, %v2663_v47 }
  0x2d   :  { %v3349_v5 = vld [vmem:[#allocation2 + $0x5a0] sm:$0xf]  ;;  %1273 = vmatmul.bf16.vlgmr.msra.gmra.mxu0 %v4213_v57  ;;  %v3222_v11 = vor.u32 %v3949_v4, %v3221_v3  ;;  %v3945_v17 = vld [vmem:[#allocation2 + $0x48c] sm:$0xf0]  ;;  %1286 = vmatmul.bf16.vlgmr.msra.gmra.mxu1 %v4219_v9  ;;  %v2647_v63 = vld [vmem:[#allocation2 + $0x30] sm:$0xf0] }
  0x2e   :  { %1318 = vmatpush.bf16.msrb.mxu0 %v3238_v62  ;;  %1331 = vmatpush.bf16.msrb.mxu1 %v3366_v1  ;;  %v3350_v14 = vor.u32 %v3981_v6, %v3349_v5  ;;  %v3205_v16 = vld [vmem:[#allocation2 + $0x480] sm:$0xf]  ;;  %v3977_v19 = vld [vmem:[#allocation2 + $0x58c] sm:$0xf0]  ;;  %v3803_v62 = vld [vmem:[#allocation2 + $0x24] sm:$0xf]  ;;  %v2794_v1 = vor.u32 %v3839_v51, %v2791_v52 }
  0x2f   :  { %v3333_v18 = vld [vmem:[#allocation2 + $0x580] sm:$0xf]  ;;  %v3206_v24 = vor.u32 %v3945_v17, %v3205_v16  ;;  %v3941_v30 = vld [vmem:[#allocation2 + $0x46c] sm:$0xf0]  ;;  %v3835_v0 = vld [vmem:[#allocation2 + $0x124] sm:$0xf]  ;;  %v2650_v7 = vor.u32 %v3803_v62, %v2647_v63 }
  0x30   :  { %1369 = vmatpush.bf16.msra.mxu2 %v2874_v61  ;;  %1357 = vmatpush.bf16.msrb.mxu3 %v2730_v2  ;;  %v3334_v27 = vor.u32 %v3977_v19, %v3333_v18  ;;  %v3189_v29 = vld [vmem:[#allocation2 + $0x460] sm:$0xf]  ;;  %v3973_v32 = vld [vmem:[#allocation2 + $0x56c] sm:$0xf0]  ;;  %v2775_v3 = vld [vmem:[#allocation2 + $0x130] sm:$0xf0] }
  0x31   :  { %v3317_v31 = vld [vmem:[#allocation2 + $0x560] sm:$0xf]  ;;  %v3190_v37 = vor.u32 %v3941_v30, %v3189_v29  ;;  %v3937_v43 = vld [vmem:[#allocation2 + $0x44c] sm:$0xf0]  ;;  %v3799_v12 = vld [vmem:[#allocation2 + $0x4] sm:$0xf]  ;;  %v2778_v19 = vor.u32 %v3835_v0, %v2775_v3 }
  0x32   :  { %1319 = vmatpush.bf16.msrb.mxu0 %v3222_v11  ;;  %1332 = vmatpush.bf16.msrb.mxu1 %v3350_v14  ;;  %v3318_v40 = vor.u32 %v3973_v32, %v3317_v31  ;;  %v3173_v42 = vld [vmem:[#allocation2 + $0x440] sm:$0xf]  ;;  %v3969_v45 = vld [vmem:[#allocation2 + $0x54c] sm:$0xf0]  ;;  %v2631_v13 = vld [vmem:[#allocation2 + $0x10] sm:$0xf0] }
  0x33   :  { %v3301_v44 = vld [vmem:[#allocation2 + $0x540] sm:$0xf]  ;;  %v3174_v50 = vor.u32 %v3937_v43, %v3173_v42  ;;  %v3933_v58 = vld [vmem:[#allocation2 + $0x42c] sm:$0xf0]  ;;  %v3891_v14 = vld [vmem:[#allocation2 + $0x2e4] sm:$0xf]  ;;  %v2634_v25 = vor.u32 %v3799_v12, %v2631_v13 }
  0x34   :  { %1370 = vmatpush.bf16.msra.mxu2 %v2858_v10  ;;  %1358 = vmatpush.bf16.msrb.mxu3 %v2714_v15  ;;  %v3302_v54 = vor.u32 %v3969_v45, %v3301_v44  ;;  %v3157_v56 = vld [vmem:[#allocation2 + $0x420] sm:$0xf]  ;;  %v3965_v61 = vld [vmem:[#allocation2 + $0x52c] sm:$0xf0]  ;;  %v2999_v15 = vld [vmem:[#allocation2 + $0x2f0] sm:$0xf0] }
  0x35   :  { %v3285_v59 = vld [vmem:[#allocation2 + $0x520] sm:$0xf]  ;;  %v3158_v2 = vor.u32 %v3933_v58, %v3157_v56  ;;  %v49_v5 = vld [vmem:[%s4839_s0 + $0x10] sm:$0xff]  ;;  %v3923_v16 = vld [vmem:[#allocation2 + $0x3e4] sm:$0xf] }
  0x36   :  { %1320 = vmatpush.bf16.msrb.mxu0 %v3206_v24  ;;  %1333 = vmatpush.bf16.msrb.mxu1 %v3334_v27  ;;  %v3141_v4 = vld [vmem:[#allocation2 + $0x400] sm:$0xf]  ;;  %v3286_v6 = vor.u32 %v3965_v61, %v3285_v59  ;;  %v3929_v8 = vld [vmem:[#allocation2 + $0x40c] sm:$0xf0]  ;;  %v3127_v17 = vld [vmem:[#allocation2 + $0x3f0] sm:$0xf0]  ;;  %v265_v18 = vunpack.c.l.b16 %v49_v5 }
  0x37   :  { %v3269_v10 = vld [vmem:[#allocation2 + $0x500] sm:$0xf]  ;;  %v3961_v11 = vld [vmem:[#allocation2 + $0x50c] sm:$0xf0]  ;;  %v3142_v20 = vor.u32 %v3929_v8, %v3141_v4  ;;  %v3955_v21 = vld [vmem:[#allocation2 + $0x4e4] sm:$0xf]  ;;  %v3130_v29 = vor.u32 %v3923_v16, %v3127_v17 }
  0x38   :  { %1371 = vmatpush.bf16.msra.mxu2 %v2842_v23  ;;  %1359 = vmatpush.bf16.msrb.mxu3 %v2698_v28  ;;  %v3255_v22 = vld [vmem:[#allocation2 + $0x4f0] sm:$0xf0]  ;;  %v266_v23 = vunpack.c.h.b16 %v49_v5  ;;  %v3270_v24 = vor.u32 %v3961_v11, %v3269_v10  ;;  %v3831_v26 = vld [vmem:[#allocation2 + $0x104] sm:$0xf]  ;;  %v3002_v28 = vor.u32 %v3891_v14, %v2999_v15  ;;  %v4233_v34 = vpack.c.b16 %v265_v18, %v265_v18 }
  0x39   :  { %v2759_v27 = vld [vmem:[#allocation2 + $0x110] sm:$0xf0]  ;;  %v3987_v30 = vld [vmem:[#allocation2 + $0x5e4] sm:$0xf]  ;;  %v3258_v33 = vor.u32 %v3955_v21, %v3255_v22 }
  0x3a   :  { %1321 = vmatpush.bf16.msrb.mxu0 %v3190_v37  ;;  %1334 = vmatpush.bf16.msrb.mxu1 %v3318_v40  ;;  %v3383_v31 = vld [vmem:[#allocation2 + $0x5f0] sm:$0xf0]  ;;  %v3887_v32 = vld [vmem:[#allocation2 + $0x2c4] sm:$0xf]  ;;  %v2762_v38 = vor.u32 %v3831_v26, %v2759_v27  ;;  %v4235_v39 = vpack.c.b16 %v266_v23, %v266_v23 }
  0x3b   :  { %3411 = vmatmul.msk.bf16.vlgmr.msrb.gmra.mxu2 %vm1261_vm0, %v4226_v48  ;;  %v2983_v35 = vld [vmem:[#allocation2 + $0x2d0] sm:$0xf0]  ;;  %v3951_v40 = vld [vmem:[#allocation2 + $0x4c4] sm:$0xf]  ;;  %v3386_v42 = vor.u32 %v3987_v30, %v3383_v31 }
  0x3c   :  { %1372 = vmatpush.bf16.msra.mxu2 %v2826_v36  ;;  %1360 = vmatpush.bf16.msrb.mxu3 %v2682_v41  ;;  %v3919_v36 = vld [vmem:[#allocation2 + $0x3c4] sm:$0xf]  ;;  %v3111_v37 = vld [vmem:[#allocation2 + $0x3d0] sm:$0xf0]  ;;  %v2986_v43 = vor.u32 %v3887_v32, %v2983_v35 }
  0x3d   :  { %v3239_v41 = vld [vmem:[#allocation2 + $0x4d0] sm:$0xf0]  ;;  %v3114_v44 = vor.u32 %v3919_v36, %v3111_v37  ;;  %v3983_v45 = vld [vmem:[#allocation2 + $0x5c4] sm:$0xf] }
  0x3e   :  { %1322 = vmatpush.bf16.msrb.mxu0 %v3174_v50  ;;  %1335 = vmatpush.bf16.msrb.mxu1 %v3302_v54  ;;  %v3367_v46 = vld [vmem:[#allocation2 + $0x5d0] sm:$0xf0]  ;;  %v3883_v47 = vld [vmem:[#allocation2 + $0x2a4] sm:$0xf] }
  0x3f   :  { %v2967_v50 = vld [vmem:[#allocation2 + $0x2b0] sm:$0xf0]  ;;  %v3915_v51 = vld [vmem:[#allocation2 + $0x3a4] sm:$0xf]  ;;  %v3370_v56 = vor.u32 %v3983_v45, %v3367_v46 }
  0x40   :  { %1373 = vmatpush.bf16.msra.mxu2 %v2810_v49  ;;  %1361 = vmatpush.bf16.msrb.mxu3 %v2666_v55  ;;  %v3242_v49 = vor.u32 %v3951_v40, %v3239_v41  ;;  %v3095_v52 = vld [vmem:[#allocation2 + $0x3b0] sm:$0xf0]  ;;  %v3947_v54 = vld [vmem:[#allocation2 + $0x4a4] sm:$0xf]  ;;  %v2970_v58 = vor.u32 %v3883_v47, %v2967_v50 }
  0x41   :  { %v3223_v55 = vld [vmem:[#allocation2 + $0x4b0] sm:$0xf0]  ;;  %v3098_v59 = vor.u32 %v3915_v51, %v3095_v52  ;;  %v3979_v61 = vld [vmem:[#allocation2 + $0x5a4] sm:$0xf] }
  0x42   :  { %1323 = vmatpush.bf16.msrb.mxu0 %v3158_v2  ;;  %1336 = vmatpush.bf16.msrb.mxu1 %v3286_v6  ;;  %v3351_v62 = vld [vmem:[#allocation2 + $0x5b0] sm:$0xf0]  ;;  %v3879_v63 = vld [vmem:[#allocation2 + $0x284] sm:$0xf]  ;;  %v3226_v0 = vor.u32 %v3947_v54, %v3223_v55 }
  0x43   :  { %v3911_v2 = vld [vmem:[#allocation2 + $0x384] sm:$0xf]  ;;  %v3079_v3 = vld [vmem:[#allocation2 + $0x390] sm:$0xf0]  ;;  %v3354_v6 = vor.u32 %v3979_v61, %v3351_v62  ;;  %v2749_v61 = vld [vmem:[#allocation2 + $0xe8] sm:$0xf] }
  0x44   :  { %1374 = vmatpush.bf16.msra.mxu2 %v2794_v1  ;;  %1362 = vmatpush.bf16.msrb.mxu3 %v2650_v7  ;;  %v2951_v1 = vld [vmem:[#allocation2 + $0x290] sm:$0xf0]  ;;  %v3943_v4 = vld [vmem:[#allocation2 + $0x484] sm:$0xf]  ;;  %v3082_v8 = vor.u32 %v3911_v2, %v3079_v3  ;;  %v3830_v62 = vld [vmem:[#allocation2 + $0xf4] sm:$0xf0] }
  0x45   :  { %v3207_v5 = vld [vmem:[#allocation2 + $0x490] sm:$0xf0]  ;;  %v2954_v7 = vor.u32 %v3879_v63, %v2951_v1  ;;  %v3975_v10 = vld [vmem:[#allocation2 + $0x584] sm:$0xf]  ;;  %v3005_v2 = vld [vmem:[#allocation2 + $0x2e8] sm:$0xf] }
  0x46   :  { %1324 = vmatpush.bf16.msrb.mxu0 %v3142_v20  ;;  %1337 = vmatpush.bf16.msrb.mxu1 %v3270_v24  ;;  %v3335_v11 = vld [vmem:[#allocation2 + $0x590] sm:$0xf0]  ;;  %v3875_v12 = vld [vmem:[#allocation2 + $0x264] sm:$0xf]  ;;  %v3210_v13 = vor.u32 %v3943_v4, %v3207_v5  ;;  %v3894_v3 = vld [vmem:[#allocation2 + $0x2f4] sm:$0xf0] }
  0x47   :  { %v2935_v14 = vld [vmem:[#allocation2 + $0x270] sm:$0xf0]  ;;  %v3907_v15 = vld [vmem:[#allocation2 + $0x364] sm:$0xf] }
  0x48   :  { %1375 = vmatpush.bf16.msra.mxu2 %v2778_v19  ;;  %1363 = vmatpush.bf16.msrb.mxu3 %v2634_v25  ;;  %v3063_v16 = vld [vmem:[#allocation2 + $0x370] sm:$0xf0]  ;;  %v3939_v17 = vld [vmem:[#allocation2 + $0x464] sm:$0xf]  ;;  %v3338_v19 = vor.u32 %v3975_v10, %v3335_v11  ;;  %v2938_v20 = vor.u32 %v3875_v12, %v2935_v14  ;;  %v2750_v10 = vor.u32 %v3830_v62, %v2749_v61  ;;  %v3133_v11 = vld [vmem:[#allocation2 + $0x3e8] sm:$0xf] }
  0x49   :  { %1325 = vmatmul.bf16.vlgmr.msrb.gmra.mxu0 %v4233_v34  ;;  %1338 = vmatmul.bf16.vlgmr.msrb.gmra.mxu1 %v4235_v39  ;;  %v3191_v18 = vld [vmem:[#allocation2 + $0x470] sm:$0xf0]  ;;  %v3066_v21 = vor.u32 %v3907_v15, %v3063_v16  ;;  %v3971_v22 = vld [vmem:[#allocation2 + $0x564] sm:$0xf]  ;;  %v3926_v12 = vld [vmem:[#allocation2 + $0x3f4] sm:$0xf0]  ;;  %v3006_v16 = vor.u32 %v3894_v3, %v3005_v2 }
  0x4a   :  { %1382 = vmatpush.bf16.msra.mxu0 %v3002_v28  ;;  %1395 = vmatpush.bf16.msra.mxu1 %v3130_v29  ;;  %v3319_v23 = vld [vmem:[#allocation2 + $0x570] sm:$0xf0]  ;;  %v3871_v24 = vld [vmem:[#allocation2 + $0x244] sm:$0xf]  ;;  %v3194_v25 = vor.u32 %v3939_v17, %v3191_v18  ;;  %v2877_v14 = vld [vmem:[#allocation2 + $0x1e8] sm:$0xf] }
  0x4b   :  { %1364 = vmatmul.bf16.vlgmr.msrb.gmra.mxu3 %v4213_v57  ;;  %v2919_v26 = vld [vmem:[#allocation2 + $0x250] sm:$0xf0]  ;;  %v3903_v27 = vld [vmem:[#allocation2 + $0x344] sm:$0xf]  ;;  %v3322_v31 = vor.u32 %v3971_v22, %v3319_v23  ;;  %v3862_v15 = vld [vmem:[#allocation2 + $0x1f4] sm:$0xf0] }
  0x4c   :  { %1408 = vmatpush.bf16.msra.mxu3 %v3258_v33  ;;  %1376 = vmatpush.bf16.msra.mxu2 %v2762_v38  ;;  %v3047_v28 = vld [vmem:[#allocation2 + $0x350] sm:$0xf0]  ;;  %v3935_v29 = vld [vmem:[#allocation2 + $0x444] sm:$0xf]  ;;  %v2922_v33 = vor.u32 %v3871_v24, %v2919_v26  ;;  %v2733_v18 = vld [vmem:[#allocation2 + $0xc8] sm:$0xf]  ;;  %v2878_v23 = vor.u32 %v3862_v15, %v2877_v14 }
  0x4d   :  { %v3175_v30 = vld [vmem:[#allocation2 + $0x450] sm:$0xf0]  ;;  %v3967_v32 = vld [vmem:[#allocation2 + $0x544] sm:$0xf]  ;;  %v3050_v35 = vor.u32 %v3903_v27, %v3047_v28  ;;  %v3890_v22 = vld [vmem:[#allocation2 + $0x2d4] sm:$0xf0] }
  0x4e   :  { %1383 = vmatpush.bf16.msra.mxu0 %v2986_v43  ;;  %1396 = vmatpush.bf16.msra.mxu1 %v3114_v44  ;;  %v3303_v36 = vld [vmem:[#allocation2 + $0x550] sm:$0xf0]  ;;  %v3867_v37 = vld [vmem:[#allocation2 + $0x224] sm:$0xf]  ;;  %v3178_v40 = vor.u32 %v3935_v29, %v3175_v30  ;;  %v3117_v24 = vld [vmem:[#allocation2 + $0x3c8] sm:$0xf] }
  0x4f   :  { %1377 = vmatmul.bf16.vlgmr.msra.gmra.mxu2 %v4219_v9  ;;  %v2903_v38 = vld [vmem:[#allocation2 + $0x230] sm:$0xf0]  ;;  %v3899_v41 = vld [vmem:[#allocation2 + $0x324] sm:$0xf]  ;;  %v3306_v45 = vor.u32 %v3967_v32, %v3303_v36  ;;  %v2861_v27 = vld [vmem:[#allocation2 + $0x1c8] sm:$0xf] }
  0x50   :  { %1421 = vmatpush.bf16.msrb.mxu2 %v3386_v42  ;;  %1409 = vmatpush.bf16.msra.mxu3 %v3242_v49  ;;  %v3031_v42 = vld [vmem:[#allocation2 + $0x330] sm:$0xf0]  ;;  %v3931_v43 = vld [vmem:[#allocation2 + $0x424] sm:$0xf]  ;;  %v2906_v50 = vor.u32 %v3867_v37, %v2903_v38  ;;  %v3858_v28 = vld [vmem:[#allocation2 + $0x1d4] sm:$0xf0] }
  0x51   :  { %v3159_v44 = vld [vmem:[#allocation2 + $0x430] sm:$0xf0]  ;;  %v3963_v46 = vld [vmem:[#allocation2 + $0x524] sm:$0xf]  ;;  %v3034_v51 = vor.u32 %v3899_v41, %v3031_v42  ;;  %v2717_v30 = vld [vmem:[#allocation2 + $0xa8] sm:$0xf]  ;;  %v2862_v36 = vor.u32 %v3858_v28, %v2861_v27 }
  0x52   :  { %1384 = vmatpush.bf16.msra.mxu0 %v2970_v58  ;;  %1397 = vmatpush.bf16.msra.mxu1 %v3098_v59  ;;  %v3287_v47 = vld [vmem:[#allocation2 + $0x530] sm:$0xf0]  ;;  %v3863_v49 = vld [vmem:[#allocation2 + $0x204] sm:$0xf]  ;;  %v3162_v55 = vor.u32 %v3931_v43, %v3159_v44  ;;  %v3101_v37 = vld [vmem:[#allocation2 + $0x3a8] sm:$0xf] }
  0x53   :  { %v2887_v52 = vld [vmem:[#allocation2 + $0x210] sm:$0xf0]  ;;  %v3895_v54 = vld [vmem:[#allocation2 + $0x304] sm:$0xf]  ;;  %v3918_v38 = vld [vmem:[#allocation2 + $0x3b4] sm:$0xf0] }
  0x54   :  { %1422 = vmatpush.bf16.msrb.mxu2 %v3370_v56  ;;  %1410 = vmatpush.bf16.msra.mxu3 %v3226_v0  ;;  %v3015_v56 = vld [vmem:[#allocation2 + $0x310] sm:$0xf0]  ;;  %v3927_v58 = vld [vmem:[#allocation2 + $0x404] sm:$0xf]  ;;  %v3290_v0 = vor.u32 %v3963_v46, %v3287_v47  ;;  %v2890_v4 = vor.u32 %v3863_v49, %v2887_v52  ;;  %v2845_v41 = vld [vmem:[#allocation2 + $0x1a8] sm:$0xf]  ;;  %v3102_v46 = vor.u32 %v3918_v38, %v3101_v37 }
  0x55   :  { %v3143_v59 = vld [vmem:[#allocation2 + $0x410] sm:$0xf0]  ;;  %v3991_v63 = vld [vmem:[#allocation2 + $0x604] sm:$0xf]  ;;  %v3018_v5 = vor.u32 %v3895_v54, %v3015_v56  ;;  %v3854_v42 = vld [vmem:[#allocation2 + $0x1b4] sm:$0xf0] }
  0x56   :  { %1385 = vmatpush.bf16.msra.mxu0 %v2954_v7  ;;  %1398 = vmatpush.bf16.msra.mxu1 %v3082_v8  ;;  %v3399_v1 = vld [vmem:[#allocation2 + $0x610] sm:$0xf0]  ;;  %v3146_v8 = vor.u32 %v3927_v58, %v3143_v59  ;;  %v2701_v44 = vld [vmem:[#allocation2 + $0x88] sm:$0xf]  ;;  %v3882_v49 = vld [vmem:[#allocation2 + $0x294] sm:$0xf0] }
  0x57   :  { %v3271_v7 = vld [vmem:[#allocation2 + $0x510] sm:$0xf0]  ;;  %v2957_v47 = vld [vmem:[#allocation2 + $0x288] sm:$0xf]  ;;  %v3914_v52 = vld [vmem:[#allocation2 + $0x394] sm:$0xf0] }
  0x58   :  { %1423 = vmatpush.bf16.msrb.mxu2 %v3354_v6  ;;  %1411 = vmatpush.bf16.msra.mxu3 %v3210_v13  ;;  %v3959_v6 = vld [vmem:[#allocation2 + $0x504] sm:$0xf]  ;;  %v3402_v13 = vor.u32 %v3991_v63, %v3399_v1  ;;  %v3850_v56 = vld [vmem:[#allocation2 + $0x194] sm:$0xf0]  ;;  %v2958_v58 = vor.u32 %v3882_v49, %v2957_v47  ;;  %v2685_v59 = vld [vmem:[#allocation2 + $0x68] sm:$0xf] }
  0x59   :  { %v3274_v17 = vor.u32 %v3959_v6, %v3271_v7  ;;  %v3814_v61 = vld [vmem:[#allocation2 + $0x74] sm:$0xf0]  ;;  %v2941_v63 = vld [vmem:[#allocation2 + $0x268] sm:$0xf] }
  0x5a   :  { %1386 = vmatpush.bf16.msra.mxu0 %v2938_v20  ;;  %1399 = vmatpush.bf16.msra.mxu1 %v3066_v21  ;;  %v3134_v20 = vor.u32 %v3926_v12, %v3133_v11  ;;  %v2989_v21 = vld [vmem:[#allocation2 + $0x2c8] sm:$0xf]  ;;  %v3910_v3 = vld [vmem:[#allocation2 + $0x374] sm:$0xf0] }
  0x5b   :  { %v2990_v29 = vor.u32 %v3890_v22, %v2989_v21  ;;  %v3069_v2 = vld [vmem:[#allocation2 + $0x368] sm:$0xf]  ;;  %v3846_v6 = vld [vmem:[#allocation2 + $0x174] sm:$0xf0] }
  0x5c   :  { %1424 = vmatpush.bf16.msrb.mxu2 %v3338_v19  ;;  %1412 = vmatpush.bf16.msra.mxu3 %v3194_v25  ;;  %v3826_v19 = vld [vmem:[#allocation2 + $0xd4] sm:$0xf0]  ;;  %v3070_v11 = vor.u32 %v3910_v3, %v3069_v2  ;;  %v2925_v12 = vld [vmem:[#allocation2 + $0x248] sm:$0xf] }
  0x5d   :  { %v3922_v25 = vld [vmem:[#allocation2 + $0x3d4] sm:$0xf0]  ;;  %v2734_v26 = vor.u32 %v3826_v19, %v2733_v18  ;;  %v3053_v15 = vld [vmem:[#allocation2 + $0x348] sm:$0xf] }
  0x5e   :  { %1387 = vmatpush.bf16.msra.mxu0 %v2922_v33  ;;  %1400 = vmatpush.bf16.msra.mxu1 %v3050_v35  ;;  %v3118_v32 = vor.u32 %v3922_v25, %v3117_v24  ;;  %v2973_v33 = vld [vmem:[#allocation2 + $0x2a8] sm:$0xf]  ;;  %v3886_v35 = vld [vmem:[#allocation2 + $0x2b4] sm:$0xf0] }
  0x5f   :  { %v2974_v43 = vor.u32 %v3886_v35, %v2973_v33  ;;  %v2797_v18 = vld [vmem:[#allocation2 + $0x148] sm:$0xf]  ;;  %v3842_v19 = vld [vmem:[#allocation2 + $0x154] sm:$0xf0] }
  0x60   :  { %1425 = vmatpush.bf16.msrb.mxu2 %v3322_v31  ;;  %1413 = vmatpush.bf16.msra.mxu3 %v3178_v40  ;;  %v3822_v31 = vld [vmem:[#allocation2 + $0xb4] sm:$0xf0]  ;;  %v2653_v21 = vld [vmem:[#allocation2 + $0x28] sm:$0xf] }
  0x61   :  { %v2718_v40 = vor.u32 %v3822_v31, %v2717_v30  ;;  %v3806_v22 = vld [vmem:[#allocation2 + $0x34] sm:$0xf0]  ;;  %v2909_v24 = vld [vmem:[#allocation2 + $0x228] sm:$0xf] }
  0x62   :  { %1388 = vmatpush.bf16.msra.mxu0 %v2906_v50  ;;  %1401 = vmatpush.bf16.msra.mxu1 %v3034_v51  ;;  %v2846_v50 = vor.u32 %v3854_v42, %v2845_v41  ;;  %v3085_v51 = vld [vmem:[#allocation2 + $0x388] sm:$0xf]  ;;  %v3870_v25 = vld [vmem:[#allocation2 + $0x234] sm:$0xf0] }
  0x63   :  { %v3086_v62 = vor.u32 %v3914_v52, %v3085_v51  ;;  %v3037_v27 = vld [vmem:[#allocation2 + $0x328] sm:$0xf]  ;;  %v3902_v28 = vld [vmem:[#allocation2 + $0x334] sm:$0xf0]  ;;  %v2910_v33 = vor.u32 %v3870_v25, %v2909_v24  ;;  %v3828_v51 = vld [vmem:[#allocation2 + $0xec] sm:$0xf] }
  0x64   :  { %1426 = vmatpush.bf16.msrb.mxu2 %v3306_v45  ;;  %1414 = vmatpush.bf16.msra.mxu3 %v3162_v55  ;;  %v3818_v45 = vld [vmem:[#allocation2 + $0x94] sm:$0xf0]  ;;  %v2829_v55 = vld [vmem:[#allocation2 + $0x188] sm:$0xf]  ;;  %v3038_v38 = vor.u32 %v3902_v28, %v3037_v27  ;;  %v2751_v52 = vld [vmem:[#allocation2 + $0xf8] sm:$0xf0] }
  0x65   :  { %v2702_v54 = vor.u32 %v3818_v45, %v2701_v44  ;;  %v2830_v1 = vor.u32 %v3850_v56, %v2829_v55  ;;  %v2781_v30 = vld [vmem:[#allocation2 + $0x128] sm:$0xf]  ;;  %v3838_v31 = vld [vmem:[#allocation2 + $0x134] sm:$0xf0]  ;;  %v2754_v3 = vor.u32 %v3828_v51, %v2751_v52  ;;  %v2847_v27 = vld [vmem:[#allocation2 + $0x1b8] sm:$0xf0] }
  0x66   :  { %1389 = vmatpush.bf16.msra.mxu0 %v2890_v4  ;;  %1402 = vmatpush.bf16.msra.mxu1 %v3018_v5  ;;  %v2686_v4 = vor.u32 %v3814_v61, %v2685_v59  ;;  %v2813_v5 = vld [vmem:[#allocation2 + $0x168] sm:$0xf]  ;;  %v3802_v35 = vld [vmem:[#allocation2 + $0x14] sm:$0xf0]  ;;  %v2782_v44 = vor.u32 %v3838_v31, %v2781_v30  ;;  %v3816_v30 = vld [vmem:[#allocation2 + $0x8c] sm:$0xf] }
  0x67   :  { %v2814_v14 = vor.u32 %v3846_v6, %v2813_v5  ;;  %v3958_v37 = vld [vmem:[#allocation2 + $0x4f4] sm:$0xf0]  ;;  %v2893_v41 = vld [vmem:[#allocation2 + $0x208] sm:$0xf]  ;;  %v3824_v5 = vld [vmem:[#allocation2 + $0xcc] sm:$0xf] }
  0x68   :  { %1427 = vmatpush.bf16.msrb.mxu2 %v3290_v0  ;;  %1415 = vmatpush.bf16.msra.mxu3 %v3146_v8  ;;  %v3878_v0 = vld [vmem:[#allocation2 + $0x274] sm:$0xf0]  ;;  %v2669_v8 = vld [vmem:[#allocation2 + $0x48] sm:$0xf]  ;;  %v2735_v6 = vld [vmem:[#allocation2 + $0xd8] sm:$0xf0] }
  0x69   :  { %1390 = vmatmul.bf16.vlgmr.msra.gmra.mxu0 %v4211_v53  ;;  %1403 = vmatmul.bf16.vlgmr.msra.gmra.mxu1 %v4215_v60  ;;  %v2942_v7 = vor.u32 %v3878_v0, %v2941_v63  ;;  %v3866_v42 = vld [vmem:[#allocation2 + $0x214] sm:$0xf0]  ;;  %v3389_v56 = vld [vmem:[#allocation2 + $0x5e8] sm:$0xf]  ;;  %v3860_v0 = vld [vmem:[#allocation2 + $0x1ec] sm:$0xf] }
  0x6a   :  { %1447 = vmatpush.bf16.msrb.mxu1 %v2750_v10  ;;  %1473 = vmatpush.bf16.msrb.mxu0 %v3006_v16  ;;  %v3810_v10 = vld [vmem:[#allocation2 + $0x54] sm:$0xf0]  ;;  %v2894_v55 = vor.u32 %v3866_v42, %v2893_v41  ;;  %v3245_v59 = vld [vmem:[#allocation2 + $0x4c8] sm:$0xf]  ;;  %v2703_v31 = vld [vmem:[#allocation2 + $0x98] sm:$0xf0] }
  0x6b   :  { %1416 = vmatmul.bf16.vlgmr.msra.gmra.mxu3 %v4233_v34  ;;  %v3906_v16 = vld [vmem:[#allocation2 + $0x354] sm:$0xf0]  ;;  %v3213_v24 = vld [vmem:[#allocation2 + $0x488] sm:$0xf]  ;;  %v2831_v41 = vld [vmem:[#allocation2 + $0x198] sm:$0xf0]  ;;  %v2706_v42 = vor.u32 %v3816_v30, %v2703_v31 }
  0x6c   :  { %1441 = vmatpush.bf16.msrb.mxu3 %v3402_v13  ;;  %1428 = vmatpush.bf16.msrb.mxu2 %v3274_v17  ;;  %v3874_v13 = vld [vmem:[#allocation2 + $0x254] sm:$0xf0]  ;;  %v2670_v17 = vor.u32 %v3810_v10, %v2669_v8  ;;  %v3373_v10 = vld [vmem:[#allocation2 + $0x5c8] sm:$0xf]  ;;  %v3135_v30 = vld [vmem:[#allocation2 + $0x3f8] sm:$0xf0] }
  0x6d   :  { %v3898_v45 = vld [vmem:[#allocation2 + $0x314] sm:$0xf0]  ;;  %v3181_v51 = vld [vmem:[#allocation2 + $0x448] sm:$0xf] }
  0x6e   :  { %1448 = vmatpush.bf16.msrb.mxu1 %v2734_v26  ;;  %1474 = vmatpush.bf16.msrb.mxu0 %v2990_v29  ;;  %v2798_v26 = vor.u32 %v3842_v19, %v2797_v18  ;;  %v2654_v29 = vor.u32 %v3806_v22, %v2653_v21  ;;  %v3994_v47 = vld [vmem:[#allocation2 + $0x614] sm:$0xf0]  ;;  %v3820_v18 = vld [vmem:[#allocation2 + $0xac] sm:$0xf]  ;;  %v2719_v19 = vld [vmem:[#allocation2 + $0xb8] sm:$0xf0] }
  0x6f   :  { %1429 = vmatmul.bf16.vlgmr.msrb.gmra.mxu2 %v4235_v39  ;;  %v3357_v22 = vld [vmem:[#allocation2 + $0x5a8] sm:$0xf]  ;;  %v3946_v25 = vld [vmem:[#allocation2 + $0x494] sm:$0xf0]  ;;  %v2722_v28 = vor.u32 %v3820_v18, %v2719_v19  ;;  %v2783_v18 = vld [vmem:[#allocation2 + $0x138] sm:$0xf0] }
  0x70   :  { %1486 = vmatpush.bf16.msra.mxu2 %v3134_v20  ;;  %1460 = vmatpush.bf16.msra.mxu3 %v2878_v23  ;;  %v2926_v20 = vor.u32 %v3874_v13, %v2925_v12  ;;  %v3054_v23 = vor.u32 %v3906_v16, %v3053_v15  ;;  %v3229_v12 = vld [vmem:[#allocation2 + $0x4a8] sm:$0xf]  ;;  %v3950_v13 = vld [vmem:[#allocation2 + $0x4b4] sm:$0xf0]  ;;  %v2863_v15 = vld [vmem:[#allocation2 + $0x1d8] sm:$0xf0]  ;;  %v2738_v16 = vor.u32 %v3824_v5, %v2735_v6 }
  0x71   :  { %v3938_v52 = vld [vmem:[#allocation2 + $0x454] sm:$0xf0]  ;;  %v2799_v5 = vld [vmem:[#allocation2 + $0x158] sm:$0xf0] }
  0x72   :  { %1449 = vmatpush.bf16.msrb.mxu1 %v2718_v40  ;;  %1475 = vmatpush.bf16.msrb.mxu0 %v2974_v43  ;;  %v2765_v40 = vld [vmem:[#allocation2 + $0x108] sm:$0xf] }
  0x73   :  { %v3021_v43 = vld [vmem:[#allocation2 + $0x308] sm:$0xf] }
  0x74   :  { %1487 = vmatpush.bf16.msra.mxu2 %v3118_v32  ;;  %1461 = vmatpush.bf16.msra.mxu3 %v2862_v36  ;;  %v2637_v32 = vld [vmem:[#allocation2 + $0x8] sm:$0xf]  ;;  %v3022_v61 = vor.u32 %v3898_v45, %v3021_v43  ;;  %v2687_v45 = vld [vmem:[#allocation2 + $0x78] sm:$0xf0] }
  0x75   :  { %v3261_v36 = vld [vmem:[#allocation2 + $0x4e8] sm:$0xf]  ;;  %v2638_v49 = vor.u32 %v3802_v35, %v2637_v32  ;;  %v3214_v32 = vor.u32 %v3946_v25, %v3213_v24  ;;  %v3800_v24 = vld [vmem:[#allocation2 + $0xc] sm:$0xf]  ;;  %v2639_v25 = vld [vmem:[#allocation2 + $0x18] sm:$0xf0] }
  0x76   :  { %1450 = vmatpush.bf16.msrb.mxu1 %v2702_v54  ;;  %1476 = vmatpush.bf16.msrb.mxu0 %v2958_v58  ;;  %v3262_v54 = vor.u32 %v3958_v37, %v3261_v36  ;;  %v3990_v58 = vld [vmem:[#allocation2 + $0x5f4] sm:$0xf0]  ;;  %v3341_v35 = vld [vmem:[#allocation2 + $0x588] sm:$0xf] }
  0x77   :  { %v3978_v36 = vld [vmem:[#allocation2 + $0x594] sm:$0xf0]  ;;  %v3197_v37 = vld [vmem:[#allocation2 + $0x468] sm:$0xf] }
  0x78   :  { %1488 = vmatpush.bf16.msra.mxu2 %v3102_v46  ;;  %1462 = vmatpush.bf16.msra.mxu3 %v2846_v50  ;;  %v3405_v46 = vld [vmem:[#allocation2 + $0x608] sm:$0xf]  ;;  %v3834_v50 = vld [vmem:[#allocation2 + $0x114] sm:$0xf0]  ;;  %v3342_v43 = vor.u32 %v3978_v36, %v3341_v35  ;;  %v3888_v35 = vld [vmem:[#allocation2 + $0x2cc] sm:$0xf]  ;;  %v2642_v36 = vor.u32 %v3800_v24, %v2639_v25 }
  0x79   :  { %v3406_v63 = vor.u32 %v3994_v47, %v3405_v46  ;;  %v2766_v2 = vor.u32 %v3834_v50, %v2765_v40  ;;  %v3848_v40 = vld [vmem:[#allocation2 + $0x18c] sm:$0xf]  ;;  %v3974_v50 = vld [vmem:[#allocation2 + $0x574] sm:$0xf0] }
  0x7a   :  { %1451 = vmatpush.bf16.msrb.mxu1 %v2686_v4  ;;  %1477 = vmatpush.bf16.msrb.mxu0 %v2942_v7  ;;  %v3390_v4 = vor.u32 %v3990_v58, %v3389_v56  ;;  %v2834_v47 = vor.u32 %v3848_v40, %v2831_v41  ;;  %v2767_v40 = vld [vmem:[#allocation2 + $0x118] sm:$0xf0]  ;;  %v3908_v24 = vld [vmem:[#allocation2 + $0x36c] sm:$0xf] }
  0x7b   :  { %3412 = vmatmul.msk.bf16.vlgmr.msrb.gmra.mxu3 %vm1261_vm0, %v4226_v48 }
  0x7c   :  { %1489 = vmatpush.bf16.msra.mxu2 %v3086_v62  ;;  %1463 = vmatpush.bf16.msra.mxu3 %v2830_v1  ;;  %v3954_v62 = vld [vmem:[#allocation2 + $0x4d4] sm:$0xf0]  ;;  %v2879_v1 = vld [vmem:[#allocation2 + $0x1f8] sm:$0xf0] }
  0x7d   :  { %v3246_v7 = vor.u32 %v3954_v62, %v3245_v59  ;;  %v2882_v8 = vor.u32 %v3860_v0, %v2879_v1  ;;  %v3808_v59 = vld [vmem:[#allocation2 + $0x4c] sm:$0xf]  ;;  %v3182_v62 = vor.u32 %v3938_v52, %v3181_v51  ;;  %v3309_v0 = vld [vmem:[#allocation2 + $0x548] sm:$0xf]  ;;  %v3970_v1 = vld [vmem:[#allocation2 + $0x554] sm:$0xf0] }
  0x7e   :  { %1452 = vmatpush.bf16.msrb.mxu1 %v2670_v17  ;;  %1478 = vmatpush.bf16.msrb.mxu0 %v2926_v20  ;;  %v3230_v20 = vor.u32 %v3950_v13, %v3229_v12  ;;  %v3293_v13 = vld [vmem:[#allocation2 + $0x528] sm:$0xf]  ;;  %v3952_v51 = vld [vmem:[#allocation2 + $0x4cc] sm:$0xf]  ;;  %v3247_v52 = vld [vmem:[#allocation2 + $0x4d8] sm:$0xf0] }
  0x80   :  { %1490 = vmatpush.bf16.msra.mxu2 %v3070_v11  ;;  %1464 = vmatpush.bf16.msra.mxu3 %v2814_v14  ;;  %v3986_v11 = vld [vmem:[#allocation2 + $0x5d4] sm:$0xf0]  ;;  %v3856_v14 = vld [vmem:[#allocation2 + $0x1cc] sm:$0xf] }
  0x81   :  { %v3374_v17 = vor.u32 %v3986_v11, %v3373_v10  ;;  %v2866_v21 = vor.u32 %v3856_v14, %v2863_v15  ;;  %v2655_v10 = vld [vmem:[#allocation2 + $0x38] sm:$0xf0]  ;;  %v3966_v14 = vld [vmem:[#allocation2 + $0x534] sm:$0xf0]  ;;  %v3149_v15 = vld [vmem:[#allocation2 + $0x408] sm:$0xf] }
  0x82   :  { %1453 = vmatpush.bf16.msrb.mxu1 %v2654_v29  ;;  %1479 = vmatpush.bf16.msrb.mxu0 %v2910_v33 }
  0x84   :  { %1491 = vmatpush.bf16.msra.mxu2 %v3054_v23  ;;  %1465 = vmatpush.bf16.msra.mxu3 %v2798_v26  ;;  %v3982_v23 = vld [vmem:[#allocation2 + $0x5b4] sm:$0xf0]  ;;  %v3852_v26 = vld [vmem:[#allocation2 + $0x1ac] sm:$0xf] }
  0x85   :  { %v3358_v29 = vor.u32 %v3982_v23, %v3357_v22  ;;  %v2850_v33 = vor.u32 %v3852_v26, %v2847_v27  ;;  %v3294_v22 = vor.u32 %v3966_v14, %v3293_v13  ;;  %v3277_v23 = vld [vmem:[#allocation2 + $0x508] sm:$0xf]  ;;  %v3087_v14 = vld [vmem:[#allocation2 + $0x398] sm:$0xf0] }
  0x86   :  { %1454 = vmatpush.bf16.msrb.mxu1 %v2638_v49  ;;  %1480 = vmatpush.bf16.msrb.mxu0 %v2894_v55  ;;  %v3325_v49 = vld [vmem:[#allocation2 + $0x568] sm:$0xf]  ;;  %v2815_v55 = vld [vmem:[#allocation2 + $0x178] sm:$0xf0] }
  0x87   :  { %v3326_v58 = vor.u32 %v3974_v50, %v3325_v49  ;;  %v3119_v50 = vld [vmem:[#allocation2 + $0x3d8] sm:$0xf0] }
  0x88   :  { %1492 = vmatpush.bf16.msra.mxu2 %v3038_v38  ;;  %1466 = vmatpush.bf16.msra.mxu3 %v2782_v44  ;;  %v3942_v38 = vld [vmem:[#allocation2 + $0x474] sm:$0xf0]  ;;  %v3812_v44 = vld [vmem:[#allocation2 + $0x6c] sm:$0xf] }
  0x89   :  { %1481 = vmatmul.bf16.vlgmr.msrb.gmra.mxu0 %v4211_v53  ;;  %1455 = vmatmul.bf16.vlgmr.msrb.gmra.mxu1 %v4213_v57  ;;  %v3198_v46 = vor.u32 %v3942_v38, %v3197_v37  ;;  %v2690_v56 = vor.u32 %v3812_v44, %v2687_v45  ;;  %v2991_v37 = vld [vmem:[#allocation2 + $0x2d8] sm:$0xf0]  ;;  %v3832_v38 = vld [vmem:[#allocation2 + $0x10c] sm:$0xf] }
  0x8a   :  { %1499 = vmatpush.bf16.msra.mxu1 %v3262_v54  ;;  %1532 = vmatpush.bf16.msra.mxu0 %v3406_v63  ;;  %v3844_v54 = vld [vmem:[#allocation2 + $0x16c] sm:$0xf]  ;;  %v2770_v49 = vor.u32 %v3832_v38, %v2767_v40 }
  0x8b   :  { %v2818_v63 = vor.u32 %v3844_v54, %v2815_v55  ;;  %v3884_v55 = vld [vmem:[#allocation2 + $0x2ac] sm:$0xf] }
  0x8c   :  { %1493 = vmatpush.bf16.msra.mxu2 %v3022_v61  ;;  %1467 = vmatpush.bf16.msra.mxu3 %v2766_v2  ;;  %v2671_v61 = vld [vmem:[#allocation2 + $0x58] sm:$0xf0]  ;;  %v3165_v2 = vld [vmem:[#allocation2 + $0x428] sm:$0xf]  ;;  %v3904_v38 = vld [vmem:[#allocation2 + $0x34c] sm:$0xf] }
  0x8d   :  { %v2674_v6 = vor.u32 %v3808_v59, %v2671_v61  ;;  %v3375_v59 = vld [vmem:[#allocation2 + $0x5d8] sm:$0xf0] }
  0x8e   :  { %1500 = vmatpush.bf16.msra.mxu1 %v3246_v7  ;;  %1551 = vmatpush.bf16.msrb.mxu0 %v2882_v8  ;;  %v3310_v7 = vor.u32 %v3970_v1, %v3309_v0  ;;  %v3804_v8 = vld [vmem:[#allocation2 + $0x2c] sm:$0xf]  ;;  %v3103_v1 = vld [vmem:[#allocation2 + $0x3b8] sm:$0xf0] }
  0x8f   :  { %1468 = vmatmul.bf16.vlgmr.msra.gmra.mxu3 %v4219_v9  ;;  %1494 = vmatmul.bf16.vlgmr.msra.gmra.mxu2 %v4215_v60  ;;  %v2658_v19 = vor.u32 %v3804_v8, %v2655_v10  ;;  %v3359_v8 = vld [vmem:[#allocation2 + $0x5b8] sm:$0xf0] }
  0x90   :  { %1538 = vmatpush.bf16.msrb.mxu2 %v2754_v3  ;;  %1512 = vmatpush.bf16.msrb.mxu3 %v3390_v4  ;;  %v3934_v3 = vld [vmem:[#allocation2 + $0x434] sm:$0xf0]  ;;  %v3840_v4 = vld [vmem:[#allocation2 + $0x14c] sm:$0xf] }
  0x91   :  { %v3166_v11 = vor.u32 %v3934_v3, %v3165_v2  ;;  %v2802_v12 = vor.u32 %v3840_v4, %v2799_v5  ;;  %v3948_v2 = vld [vmem:[#allocation2 + $0x4ac] sm:$0xf]  ;;  %v3231_v3 = vld [vmem:[#allocation2 + $0x4b8] sm:$0xf0] }
  0x92   :  { %1501 = vmatpush.bf16.msra.mxu1 %v3230_v20  ;;  %1552 = vmatpush.bf16.msrb.mxu0 %v2866_v21  ;;  %v3892_v20 = vld [vmem:[#allocation2 + $0x2ec] sm:$0xf]  ;;  %v3007_v21 = vld [vmem:[#allocation2 + $0x2f8] sm:$0xf0] }
  0x93   :  { %v3010_v31 = vor.u32 %v3892_v20, %v3007_v21  ;;  %v3880_v5 = vld [vmem:[#allocation2 + $0x28c] sm:$0xf]  ;;  %v3343_v21 = vld [vmem:[#allocation2 + $0x598] sm:$0xf0] }
  0x94   :  { %1539 = vmatpush.bf16.msrb.mxu2 %v2738_v16  ;;  %1513 = vmatpush.bf16.msrb.mxu3 %v3374_v17  ;;  %v3930_v16 = vld [vmem:[#allocation2 + $0x414] sm:$0xf0]  ;;  %v3836_v17 = vld [vmem:[#allocation2 + $0x12c] sm:$0xf] }
  0x95   :  { %v3150_v26 = vor.u32 %v3930_v16, %v3149_v15  ;;  %v2786_v27 = vor.u32 %v3836_v17, %v2783_v18  ;;  %v3944_v15 = vld [vmem:[#allocation2 + $0x48c] sm:$0xf]  ;;  %v3215_v16 = vld [vmem:[#allocation2 + $0x498] sm:$0xf0] }
  0x96   :  { %1502 = vmatpush.bf16.msra.mxu1 %v3214_v32  ;;  %1553 = vmatpush.bf16.msrb.mxu0 %v2850_v33  ;;  %v3956_v32 = vld [vmem:[#allocation2 + $0x4ec] sm:$0xf]  ;;  %v3263_v33 = vld [vmem:[#allocation2 + $0x4f8] sm:$0xf0] }
  0x97   :  { %v3266_v45 = vor.u32 %v3956_v32, %v3263_v33  ;;  %v3876_v18 = vld [vmem:[#allocation2 + $0x26c] sm:$0xf]  ;;  %v3327_v33 = vld [vmem:[#allocation2 + $0x578] sm:$0xf0] }
  0x98   :  { %1540 = vmatpush.bf16.msrb.mxu2 %v2722_v28  ;;  %1514 = vmatpush.bf16.msrb.mxu3 %v3358_v29  ;;  %v3962_v28 = vld [vmem:[#allocation2 + $0x514] sm:$0xf0]  ;;  %v3924_v29 = vld [vmem:[#allocation2 + $0x3ec] sm:$0xf] }
  0x99   :  { %3413 = vmatmul.msk.bf16.vlgmr.msra.gmra.mxu0 %vm1261_vm0, %v4226_v48  ;;  %v3278_v41 = vor.u32 %v3962_v28, %v3277_v23  ;;  %v3138_v44 = vor.u32 %v3924_v29, %v3135_v30  ;;  %v3218_v23 = vor.u32 %v3944_v15, %v3215_v16  ;;  %v3199_v28 = vld [vmem:[#allocation2 + $0x478] sm:$0xf0]  ;;  %v3872_v30 = vld [vmem:[#allocation2 + $0x24c] sm:$0xf] }
  0x9a   :  { %1503 = vmatpush.bf16.msra.mxu1 %v3198_v46  ;;  %1554 = vmatpush.bf16.msrb.mxu0 %v2834_v47  ;;  %v3920_v46 = vld [vmem:[#allocation2 + $0x3cc] sm:$0xf]  ;;  %v2994_v47 = vor.u32 %v3888_v35, %v2991_v37 }
  0x9b   :  { %v3122_v61 = vor.u32 %v3920_v46, %v3119_v50  ;;  %v3972_v32 = vld [vmem:[#allocation2 + $0x56c] sm:$0xf] }
  0x9c   :  { %1541 = vmatpush.bf16.msrb.mxu2 %v2706_v42  ;;  %1515 = vmatpush.bf16.msrb.mxu3 %v3342_v43  ;;  %v3988_v42 = vld [vmem:[#allocation2 + $0x5ec] sm:$0xf]  ;;  %v3391_v43 = vld [vmem:[#allocation2 + $0x5f8] sm:$0xf0] }
  0x9d   :  { %v3394_v54 = vor.u32 %v3988_v42, %v3391_v43  ;;  %v3055_v42 = vld [vmem:[#allocation2 + $0x358] sm:$0xf0]  ;;  %v3936_v43 = vld [vmem:[#allocation2 + $0x44c] sm:$0xf] }
  0x9e   :  { %1504 = vmatpush.bf16.msra.mxu1 %v3182_v62  ;;  %1555 = vmatpush.bf16.msrb.mxu0 %v2818_v63  ;;  %v3250_v62 = vor.u32 %v3952_v51, %v3247_v52  ;;  %v3916_v63 = vld [vmem:[#allocation2 + $0x3ac] sm:$0xf]  ;;  %v3311_v51 = vld [vmem:[#allocation2 + $0x558] sm:$0xf0]  ;;  %v3058_v52 = vor.u32 %v3904_v38, %v3055_v42 }
  0x9f   :  { %v3106_v10 = vor.u32 %v3916_v63, %v3103_v1  ;;  %v3868_v46 = vld [vmem:[#allocation2 + $0x22c] sm:$0xf] }
  0xa0   :  { %1542 = vmatpush.bf16.msrb.mxu2 %v2690_v56  ;;  %1516 = vmatpush.bf16.msrb.mxu3 %v3326_v58  ;;  %v2975_v56 = vld [vmem:[#allocation2 + $0x2b8] sm:$0xf0]  ;;  %v3984_v58 = vld [vmem:[#allocation2 + $0x5cc] sm:$0xf] }
  0xa1   :  { %v2978_v0 = vor.u32 %v3884_v55, %v2975_v56  ;;  %v3378_v4 = vor.u32 %v3984_v58, %v3375_v59  ;;  %v3968_v50 = vld [vmem:[#allocation2 + $0x54c] sm:$0xf]  ;;  %v3039_v58 = vld [vmem:[#allocation2 + $0x338] sm:$0xf0] }
  0xa2   :  { %1505 = vmatpush.bf16.msra.mxu1 %v3166_v11  ;;  %1556 = vmatpush.bf16.msrb.mxu0 %v2802_v12  ;;  %v3234_v11 = vor.u32 %v3948_v2, %v3231_v3  ;;  %v3912_v12 = vld [vmem:[#allocation2 + $0x38c] sm:$0xf]  ;;  %v3295_v3 = vld [vmem:[#allocation2 + $0x538] sm:$0xf0] }
  0xa3   :  { %v3900_v55 = vld [vmem:[#allocation2 + $0x32c] sm:$0xf] }
  0xa4   :  { %1543 = vmatpush.bf16.msrb.mxu2 %v2674_v6  ;;  %1517 = vmatpush.bf16.msrb.mxu3 %v3310_v7  ;;  %v2959_v6 = vld [vmem:[#allocation2 + $0x298] sm:$0xf0]  ;;  %v3980_v7 = vld [vmem:[#allocation2 + $0x5ac] sm:$0xf] }
  0xa5   :  { %v2962_v13 = vor.u32 %v3880_v5, %v2959_v6  ;;  %v3362_v17 = vor.u32 %v3980_v7, %v3359_v8  ;;  %v3932_v59 = vld [vmem:[#allocation2 + $0x42c] sm:$0xf]  ;;  %v3407_v5 = vld [vmem:[#allocation2 + $0x618] sm:$0xf0]  ;;  %v3042_v7 = vor.u32 %v3900_v55, %v3039_v58 }
  0xa6   :  { %1506 = vmatpush.bf16.msra.mxu1 %v3150_v26  ;;  %1557 = vmatpush.bf16.msrb.mxu0 %v2786_v27  ;;  %v3071_v26 = vld [vmem:[#allocation2 + $0x378] sm:$0xf0]  ;;  %v3940_v27 = vld [vmem:[#allocation2 + $0x46c] sm:$0xf] }
  0xa7   :  { %v3202_v37 = vor.u32 %v3940_v27, %v3199_v28  ;;  %v3864_v63 = vld [vmem:[#allocation2 + $0x20c] sm:$0xf]  ;;  %v4010_v28 = vld [vmem:[%s4842_s3 + $0x78] sm:$0xff] }
  0xa8   :  { %1544 = vmatpush.bf16.msrb.mxu2 %v2658_v19  ;;  %1518 = vmatpush.bf16.msrb.mxu3 %v3294_v22  ;;  %v2943_v19 = vld [vmem:[#allocation2 + $0x278] sm:$0xf0]  ;;  %v3090_v22 = vor.u32 %v3912_v12, %v3087_v14  ;;  %v3964_v1 = vld [vmem:[#allocation2 + $0x52c] sm:$0xf] }
  0xa9   :  { %1507 = vmatmul.bf16.vlgmr.msra.gmra.mxu1 %v4233_v34  ;;  %v2946_v25 = vor.u32 %v3876_v18, %v2943_v19  ;;  %v3896_v12 = vld [vmem:[#allocation2 + $0x30c] sm:$0xf]  ;;  %v3298_v15 = vor.u32 %v3964_v1, %v3295_v3 }
  0xaa   :  { %1564 = vmatpush.bf16.msrb.mxu1 %v3010_v31  ;;  %1558 = vmatpush.bf16.msrb.mxu0 %v2770_v49  ;;  %v4257_v20 = vpop.f32.mrf.mxu0  ;;  %v4259_v29 = vpop.f32.mrf.mxu1  ;;  %v2927_v31 = vld [vmem:[#allocation2 + $0x258] sm:$0xf0]  ;;  %v3928_v16 = vld [vmem:[#allocation2 + $0x40c] sm:$0xf] }
  0xab   :  { %v2930_v40 = vor.u32 %v3872_v30, %v2927_v31  ;;  %v3960_v19 = vld [vmem:[#allocation2 + $0x50c] sm:$0xf]  ;;  %v4009_v31 = vld [vmem:[%s4842_s3 + $0x70] sm:$0xff] }
  0xac   :  { %1545 = vmatpush.bf16.msrb.mxu2 %v2642_v36  ;;  %1519 = vmatpush.bf16.msrb.mxu3 %v3278_v41  ;;  %v3074_v36 = vor.u32 %v3908_v24, %v3071_v26  ;;  %v4002_v24 = vld [vmem:[%s4842_s3 + $0x38] sm:$0xff] }
  0xad   :  { %1559 = vmatmul.bf16.vlgmr.msrb.gmra.mxu0 %v4219_v9  ;;  %v4261_v35 = vpop.f32.mrf.mxu2 }
  0xae   :  { %1565 = vmatpush.bf16.msrb.mxu1 %v2994_v47  ;;  %1603 = vmatpush.bf16.msra.mxu0 %v3394_v54  ;;  %v4263_v41 = vpop.f32.mrf.mxu3  ;;  %v2911_v47 = vld [vmem:[#allocation2 + $0x238] sm:$0xf0] }
  0xaf   :  { %1520 = vmatmul.bf16.vlgmr.msrb.gmra.mxu3 %v4235_v39  ;;  %1546 = vmatmul.bf16.vlgmr.msrb.gmra.mxu2 %v4213_v57  ;;  %v3976_v57 = vld [vmem:[#allocation2 + $0x58c] sm:$0xf]  ;;  %v2914_v56 = vor.u32 %v3868_v46, %v2911_v47 }
  0xb0   :  { %1577 = vmatpush.bf16.msra.mxu3 %v3138_v44  ;;  %1590 = vmatpush.bf16.msra.mxu2 %v3266_v45  ;;  %v3346_v9 = vor.u32 %v3976_v57, %v3343_v21  ;;  %v3183_v44 = vld [vmem:[#allocation2 + $0x458] sm:$0xf0]  ;;  %v3330_v45 = vor.u32 %v3972_v32, %v3327_v33  ;;  %v3996_v46 = vld [vmem:[%s4842_s3 + $0x8] sm:$0xff] }
  0xb1   :  { %v3186_v54 = vor.u32 %v3936_v43, %v3183_v44  ;;  %v3279_v57 = vld [vmem:[#allocation2 + $0x518] sm:$0xf0] }
  0xb2   :  { %1566 = vmatpush.bf16.msrb.mxu1 %v2978_v0  ;;  %1604 = vmatpush.bf16.msra.mxu0 %v3378_v4  ;;  %v1276_v49 = vpop.f32.mrf.mxu0  ;;  %v2895_v0 = vld [vmem:[#allocation2 + $0x218] sm:$0xf0]  ;;  %v1289_v2 = vpop.f32.mrf.mxu1  ;;  %v3992_v4 = vld [vmem:[#allocation2 + $0x60c] sm:$0xf] }
  0xb3   :  { %v3410_v18 = vor.u32 %v3992_v4, %v3407_v5  ;;  %v4018_v5 = vld [vmem:[%s4842_s3 + $0xb8] sm:$0xff] }
  0xb4   :  { %1578 = vmatpush.bf16.msra.mxu3 %v3122_v61  ;;  %1591 = vmatpush.bf16.msra.mxu2 %v3250_v62  ;;  %v3167_v61 = vld [vmem:[#allocation2 + $0x438] sm:$0xf0]  ;;  %v3314_v62 = vor.u32 %v3968_v50, %v3311_v51  ;;  %v3995_v50 = vld [vmem:[%s4842_s3] sm:$0xff] }
  0xb5   :  { %v1302_v6 = vpop.f32.mrf.mxu2  ;;  %v3170_v8 = vor.u32 %v3932_v59, %v3167_v61 }
  0xb6   :  { %1567 = vmatpush.bf16.msrb.mxu1 %v2962_v13  ;;  %1605 = vmatpush.bf16.msra.mxu0 %v3362_v17  ;;  %v3023_v13 = vld [vmem:[#allocation2 + $0x318] sm:$0xf0]  ;;  %v1315_v14 = vpop.f32.mrf.mxu3  ;;  %v4017_v6 = vld [vmem:[%s4842_s3 + $0xb0] sm:$0xff] }
  0xb7   :  { %v3151_v17 = vld [vmem:[#allocation2 + $0x418] sm:$0xf0] }
  0xb8   :  { %1579 = vmatpush.bf16.msra.mxu3 %v3106_v10  ;;  %1592 = vmatpush.bf16.msra.mxu2 %v3234_v11  ;;  %v4268_v10 = vld [vmem:[%s4841_s2] sm:$0xf]  ;;  %v2898_v11 = vor.u32 %v3864_v63, %v2895_v0 }
  0xb9   :  { %v249_v21 = vperm.slane %v4268_v10, 0  ;;  %v250_v59 = vperm.slane %v4268_v10, 1 }
  0xba   :  { %1568 = vmatpush.bf16.msrb.mxu1 %v2946_v25  ;;  %1606 = vmatpush.bf16.msra.mxu0 %v3346_v9  ;;  %v3282_v25 = vor.u32 %v3960_v19, %v3279_v57  ;;  %v4001_v9 = vld [vmem:[%s4842_s3 + $0x30] sm:$0xff]  ;;  %v4014_v57 = vld [vmem:[%s4842_s3 + $0x98] sm:$0xff] }
  0xbb   :  { %v1275_v26 = vadd.f32 %v4257_v20, %v249_v21  ;;  %v4013_v21 = vld [vmem:[%s4842_s3 + $0x90] sm:$0xff] }
  0xbc   :  { %1580 = vmatpush.bf16.msra.mxu3 %v3090_v22  ;;  %1593 = vmatpush.bf16.msra.mxu2 %v3218_v23  ;;  %v3026_v22 = vor.u32 %v3896_v12, %v3023_v13  ;;  %v3154_v23 = vor.u32 %v3928_v16, %v3151_v17  ;;  %v4016_v13 = vld [vmem:[%s4842_s3 + $0xa8] sm:$0xff] }
  0xbd   :  { %v1288_v20 = vadd.f32 %v4259_v29, %v1275_v26 }
  0xbe   :  { %1569 = vmatpush.bf16.msrb.mxu1 %v2930_v40  ;;  %1607 = vmatpush.bf16.msra.mxu0 %v3330_v45  ;;  %v1352_v27 = vpop.f32.mrf.mxu2  ;;  %v4007_v40 = vld [vmem:[%s4842_s3 + $0x60] sm:$0xff]  ;;  %v4006_v45 = vld [vmem:[%s4842_s3 + $0x58] sm:$0xff] }
  0xbf   :  { %v1301_v32 = vadd.f32 %v4261_v35, %v1288_v20  ;;  %v4011_v20 = vld [vmem:[%s4842_s3 + $0x80] sm:$0xff] }
  0xc0   :  { %1581 = vmatpush.bf16.msra.mxu3 %v3074_v36  ;;  %1594 = vmatpush.bf16.msra.mxu2 %v3202_v37  ;;  %v3998_v36 = vld [vmem:[%s4842_s3 + $0x18] sm:$0xff] }
  0xc1   :  { %v1314_v29 = vadd.f32 %v4263_v41, %v1301_v32  ;;  %v3997_v41 = vld [vmem:[%s4842_s3 + $0x10] sm:$0xff] }
  0xc2   :  { %1570 = vmatpush.bf16.msrb.mxu1 %v2914_v56  ;;  %1608 = vmatpush.bf16.msra.mxu0 %v3314_v62  ;;  %v4003_v56 = vld [vmem:[%s4842_s3 + $0x40] sm:$0xff]  ;;  %v4025_v32 = vld [vmem:[%s4842_s3 + $0xf0] sm:$0xff] }
  0xc4   :  { %1582 = vmatpush.bf16.msra.mxu3 %v3058_v52  ;;  %1595 = vmatpush.bf16.msra.mxu2 %v3186_v54  ;;  %v4004_v54 = vld [vmem:[%s4842_s3 + $0x48] sm:$0xff] }
  0xc6   :  { %1571 = vmatpush.bf16.msrb.mxu1 %v2898_v11  ;;  %1609 = vmatpush.bf16.msra.mxu0 %v3298_v15  ;;  %v1326_v30 = vpop.f32.mrf.mxu0  ;;  %v1339_v33 = vpop.f32.mrf.mxu1  ;;  %v4015_v15 = vld [vmem:[%s4842_s3 + $0xa0] sm:$0xff] }
  0xc7   :  { %v1327_v35 = vadd.f32 %v1326_v30, %v1314_v29  ;;  %v4024_v29 = vld [vmem:[%s4842_s3 + $0xe8] sm:$0xff] }
  0xc8   :  { %1583 = vmatpush.bf16.msra.mxu3 %v3042_v7  ;;  %1596 = vmatpush.bf16.msra.mxu2 %v3170_v8 }
  0xc9   :  { %1572 = vmatmul.bf16.vlgmr.msrb.gmra.mxu1 %v4211_v53  ;;  %v4000_v53 = vld [vmem:[%s4842_s3 + $0x28] sm:$0xff]  ;;  %v1340_v44 = vadd.f32 %v1339_v33, %v1327_v35  ;;  %v251_v33 = vperm.slane %v4268_v10, 2  ;;  %v4023_v35 = vld [vmem:[%s4842_s3 + $0xe0] sm:$0xff] }
  0xca   :  { %1623 = vmatpush.bf16.msra.mxu1 %v3410_v18  ;;  %1610 = vmatpush.bf16.msra.mxu0 %v3282_v25  ;;  %v4012_v25 = vld [vmem:[%s4842_s3 + $0x88] sm:$0xff] }
  0xcb   :  { %v1353_v47 = vadd.f32 %v1352_v27, %v1340_v44 }
  0xcc   :  { %1584 = vmatpush.bf16.msra.mxu3 %v3026_v22  ;;  %1597 = vmatpush.bf16.msra.mxu2 %v3154_v23 }
  0xcd   :  { %1611 = vmatmul.bf16.vlgmr.msra.gmra.mxu0 %v4235_v39  ;;  %v4008_v39 = vld [vmem:[%s4842_s3 + $0x68] sm:$0xff]  ;;  %v1629_v52 = vmax.f32 %v1353_v47, 0.0 }
  0xce   :  { %1910 = vmatpush.bf16.msrb.mxu1 %v4010_v28  ;;  %v1365_v37 = vpop.f32.mrf.mxu3  ;;  %v1328_v38 = vpop.f32.mrf.mxu0 }
  0xcf   :  { %1585 = vmatmul.bf16.vlgmr.msra.gmra.mxu3 %v4215_v60  ;;  %1598 = vmatmul.bf16.vlgmr.msra.gmra.mxu2 %v4233_v34  ;;  %v1354_v60 = vpop.f32.mrf.mxu2  ;;  %v3999_v34 = vld [vmem:[%s4842_s3 + $0x20] sm:$0xff]  ;;  %v1341_v42 = vpop.f32.mrf.mxu1  ;;  %v1633_v55 = vpack.c.bf16 %v1629_v52, %v1629_v52  ;;  %v1366_v62 = vadd.f32 %v1365_v37, %v250_v59  ;;  %v252_v59 = vperm.slane %v4268_v10, 3 }
  0xd0   :  { %1897 = vmatpush.bf16.msrb.mxu3 %v4002_v24  ;;  %1923 = vmatpush.bf16.msrb.mxu2 %v4018_v5 }
  0xd2   :  { %1911 = vmatpush.bf16.msrb.mxu1 %v4009_v31 }
  0xd4   :  { %1898 = vmatpush.bf16.msrb.mxu3 %v4001_v9  ;;  %1924 = vmatpush.bf16.msrb.mxu2 %v4017_v6 }
  0xd6   :  { %1912 = vmatpush.bf16.msrb.mxu1 %v4008_v39  ;;  %v1367_v49 = vpop.f32.mrf.mxu3 }
  0xd7   :  { %v1378_v43 = vpop.f32.mrf.mxu2 }
  0xd8   :  { %1899 = vmatpush.bf16.msrb.mxu3 %v4000_v53  ;;  %v1379_v2 = vadd.f32 %v1378_v43, %v1366_v62  ;;  %1925 = vmatpush.bf16.msrb.mxu2 %v4016_v13  ;;  %v4026_v53 = vld [vmem:[%s4842_s3 + $0xf8] sm:$0xff] }
  0xd9   :  { %3414 = vmatmul.msk.bf16.vlgmr.msra.gmra.mxu1 %vm1261_vm0, %v4226_v48  ;;  %v4005_v48 = vld [vmem:[%s4842_s3 + $0x50] sm:$0xff]  ;;  %1936 = vmatpush.bf16.msrb.mxu0 %v4026_v53  ;;  %v4027_v53 = vld [vmem:[%s4844_s5] sm:$0xff]  ;;  %vm4857_vm0 = vmmov %vm4855_vm7 }
  0xda   :  { %1913 = vmatpush.bf16.msrb.mxu1 %v4007_v40  ;;  %v4022_v40 = vld [vmem:[%s4842_s3 + $0xd8] sm:$0xff] }
  0xdc   :  { %1900 = vmatpush.bf16.msrb.mxu3 %v3999_v34  ;;  %1926 = vmatpush.bf16.msrb.mxu2 %v4015_v15 }
  0xdd   :  { %1937 = vmatpush.bf16.msrb.mxu0 %v4025_v32  ;;  %v4087_v32 = vld [vmem:[%s4846_s7 + $0x1a0] sm:$0xf0] }
  0xde   :  { %1914 = vmatpush.bf16.msrb.mxu1 %v4006_v45  ;;  %v4021_v45 = vld [vmem:[%s4842_s3 + $0xd0] sm:$0xff] }
  0xdf   :  { %v1380_v51 = vpop.f32.mrf.mxu2 }
  0xe0   :  { %1901 = vmatpush.bf16.msrb.mxu3 %v3998_v36  ;;  %1927 = vmatpush.bf16.msrb.mxu2 %v4014_v57 }
  0xe1   :  { %1938 = vmatpush.bf16.msrb.mxu0 %v4024_v29  ;;  %v4088_v29 = vld [vmem:[%s4846_s7 + $0x1a8] sm:$0xf0] }
  0xe2   :  { %1915 = vmatpush.bf16.msrb.mxu1 %v4005_v48 }
  0xe4   :  { %1902 = vmatpush.bf16.msrb.mxu3 %v3997_v41  ;;  %1928 = vmatpush.bf16.msrb.mxu2 %v4013_v21 }
  0xe5   :  { %1939 = vmatpush.bf16.msrb.mxu0 %v4023_v35 }
  0xe6   :  { %1916 = vmatpush.bf16.msrb.mxu1 %v4004_v54  ;;  %v1391_v58 = vpop.f32.mrf.mxu0  ;;  %v1404_v61 = vpop.f32.mrf.mxu1 }
  0xe7   :  { %v1392_v4 = vadd.f32 %v1391_v58, %v1379_v2 }
  0xe8   :  { %1903 = vmatpush.bf16.msrb.mxu3 %v3996_v46  ;;  %1929 = vmatpush.bf16.msrb.mxu2 %v4012_v25  ;;  %v4033_v25 = vld [vmem:[%s4844_s5 + $0x30] sm:$0xff] }
  0xe9   :  { %v1405_v8 = vadd.f32 %v1404_v61, %v1392_v4  ;;  %1940 = vmatpush.bf16.msrb.mxu0 %v4022_v40  ;;  %v4077_v40 = vld [vmem:[%s4846_s7 + $0x154] sm:$0xf] }
  0xea   :  { %1917 = vmatpush.bf16.msrb.mxu1 %v4003_v56 }
  0xec   :  { %1904 = vmatpush.bf16.msrb.mxu3 %v3995_v50  ;;  %1930 = vmatpush.bf16.msrb.mxu2 %v4011_v20  ;;  %v4020_v50 = vld [vmem:[%s4842_s3 + $0xc8] sm:$0xff] }
  0xed   :  { %1941 = vmatpush.bf16.msrb.mxu0 %v4021_v45  ;;  %v4028_v20 = vld [vmem:[%s4844_s5 + $0x8] sm:$0xff] }
  0xee   :  { %v1417_v63 = vpop.f32.mrf.mxu3  ;;  %v1393_v0 = vpop.f32.mrf.mxu0 }
  0xef   :  { %1905 = vmatmul.bf16.vlgmr.msrb.gmra.mxu3 %v1633_v55  ;;  %v1406_v3 = vpop.f32.mrf.mxu1  ;;  %v1418_v12 = vadd.f32 %v1417_v63, %v1405_v8  ;;  %v4019_v55 = vld [vmem:[%s4842_s3 + $0xc0] sm:$0xff] }
  0xf1   :  { %1942 = vmatpush.bf16.msrb.mxu0 %v4020_v50  ;;  %v4070_v50 = vld [vmem:[%s4846_s7 + $0x11c] sm:$0xf] }
  0xf2   :  { %v1430_v1 = vpop.f32.mrf.mxu2 }
  0xf3   :  { %v1431_v14 = vadd.f32 %v1430_v1, %v1418_v12 }
  0xf5   :  { %1943 = vmatpush.bf16.msrb.mxu0 %v4019_v55 }
  0xf6   :  { %v1419_v7 = vpop.f32.mrf.mxu3 }
  0xfa   :  { %v1432_v11 = vpop.f32.mrf.mxu2 }
  0xfe   :  { %v1443_v16 = vpop.f32.mrf.mxu3 }
  0xff   :  { %v1444_v17 = vadd.f32 %v1443_v16, %v1431_v14 }
 0x101   :  { %v1630_v18 = vmax.f32 %v1444_v17, 0.0 }
 0x103   :  { %v1634_v19 = vpack.c.bf16 %v1630_v18, %v1630_v18 }
 0x105   :  { %1918 = vmatmul.bf16.vlgmr.msrb.gmra.mxu1 %v1634_v19  ;;  %v4097_v19 = vld [vmem:[%s4843_s4] ss:$0 sm:$0xff] }
 0x106   :  { %v1445_v22 = vpop.f32.mrf.mxu3  ;;  %v1482_v23 = vpop.f32.mrf.mxu0 }
 0x107   :  { %v1456_v24 = vpop.f32.mrf.mxu1 }
 0x108   :  { %v1457_v34 = vadd.f32 %v1456_v24, %v251_v33  ;;  %v4034_v24 = vld [vmem:[%s4844_s5 + $0x38] sm:$0xff]  ;;  %v4084_v33 = vld [vmem:[%s4846_s7 + $0x18c] sm:$0xf] }
 0x109   :  { %2019 = vmatpush.bf16.msra.mxu3 %v4034_v24 }
 0x10d   :  { %2020 = vmatpush.bf16.msra.mxu3 %v4033_v25 }
 0x10e   :  { %v1484_v27 = vpop.f32.mrf.mxu0 }
 0x10f   :  { %v1458_v9 = vpop.f32.mrf.mxu1  ;;  %v4031_v27 = vld [vmem:[%s4844_s5 + $0x20] sm:$0xff] }
 0x110   :  { %v4029_v9 = vld [vmem:[%s4844_s5 + $0x10] sm:$0xff] }
 0x112   :  { %v1469_v26 = vpop.f32.mrf.mxu3  ;;  %v1495_v28 = vpop.f32.mrf.mxu2 }
 0x113   :  { %v1470_v36 = vadd.f32 %v1469_v26, %v1457_v34  ;;  %v4032_v26 = vld [vmem:[%s4844_s5 + $0x28] sm:$0xff] }
 0x114   :  { %2021 = vmatpush.bf16.msra.mxu3 %v4032_v26  ;;  %v3775_v34 = vld [vmem:[%s4846_s7 + $0x1a4] sm:$0xf0] }
 0x115   :  { %v1483_v38 = vadd.f32 %v1482_v23, %v1470_v36  ;;  %v3778_v36 = vor.u32 %v4084_v33, %v3775_v34  ;;  %v3605_v33 = vld [vmem:[%s4846_s7 + $0x38] sm:$0xf] }
 0x116   :  { %v1534_v31 = vpop.f32.mrf.mxu0 }
 0x117   :  { %v1496_v42 = vadd.f32 %v1495_v28, %v1483_v38  ;;  %v4030_v28 = vld [vmem:[%s4844_s5 + $0x18] sm:$0xff]  ;;  %v4080_v38 = vld [vmem:[%s4846_s7 + $0x168] sm:$0xf0]  ;;  %2399 = vmatpush.bf16.msra.mxu2 %v3778_v36 }
 0x118   :  { %2022 = vmatpush.bf16.msra.mxu3 %v4031_v27  ;;  %v4049_v27 = vld [vmem:[%s4846_s7 + $0x74] sm:$0xf]  ;;  %v4042_v36 = vld [vmem:[%s4846_s7 + $0x3c] sm:$0xf] }
 0x11a   :  { %v1471_v30 = vpop.f32.mrf.mxu3  ;;  %v1497_v60 = vpop.f32.mrf.mxu2 }
 0x11c   :  { %2023 = vmatpush.bf16.msra.mxu3 %v4030_v28  ;;  %v4064_v28 = vld [vmem:[%s4846_s7 + $0xec] sm:$0xf] }
 0x11e   :  { %v1536_v39 = vpop.f32.mrf.mxu0 }
 0x11f   :  { %v3781_v39 = vld [vmem:[%s4846_s7 + $0x190] sm:$0xf] }
 0x120   :  { %2024 = vmatpush.bf16.msra.mxu3 %v4029_v9  ;;  %v3782_v35 = vor.u32 %v4088_v29, %v3781_v39  ;;  %v3699_v9 = vld [vmem:[%s4846_s7 + $0x104] sm:$0xf0] }
 0x121   :  { %v3702_v34 = vor.u32 %v4064_v28, %v3699_v9 }
 0x122   :  { %2412 = vmatpush.bf16.msra.mxu0 %v3782_v35  ;;  %v4057_v35 = vld [vmem:[%s4846_s7 + $0xb4] sm:$0xf] }
 0x124   :  { %2025 = vmatpush.bf16.msra.mxu3 %v4028_v20  ;;  %v3635_v20 = vld [vmem:[%s4846_s7 + $0x8c] sm:$0xf0] }
 0x125   :  { %v3638_v39 = vor.u32 %v4049_v27, %v3635_v20  ;;  %v3735_v27 = vld [vmem:[%s4846_s7 + $0x144] sm:$0xf0]  ;;  %v3741_v20 = vld [vmem:[%s4846_s7 + $0x130] sm:$0xf] }
 0x126   :  { %v1508_v37 = vpop.f32.mrf.mxu1 }
 0x127   :  { %v1509_v43 = vadd.f32 %v1508_v37, %v1496_v42  ;;  %v3745_v37 = vld [vmem:[%s4846_s7 + $0x150] sm:$0xf] }
 0x128   :  { %2026 = vmatpush.bf16.msra.mxu3 %v4027_v53  ;;  %v3746_v42 = vor.u32 %v4080_v38, %v3745_v37  ;;  %v3641_v53 = vld [vmem:[%s4846_s7 + $0x78] sm:$0xf]  ;;  %v3671_v37 = vld [vmem:[%s4846_s7 + $0xcc] sm:$0xf0] }
 0x129   :  { %v3607_v38 = vld [vmem:[%s4846_s7 + $0x54] sm:$0xf0] }
 0x12a   :  { %v1560_v41 = vpop.f32.mrf.mxu0 }
 0x12e   :  { %v1510_v44 = vpop.f32.mrf.mxu1 }
 0x12f   :  { %v4081_v44 = vld [vmem:[%s4846_s7 + $0x170] sm:$0xf0] }
 0x132   :  { %v1521_v46 = vpop.f32.mrf.mxu3  ;;  %v1547_v47 = vpop.f32.mrf.mxu2 }
 0x133   :  { %v1522_v48 = vadd.f32 %v1521_v46, %v1509_v43  ;;  %v1562_v52 = vpop.f32.mrf.mxu0  ;;  %v1548_v61 = vadd.f32 %v1547_v47, %v252_v59  ;;  %v3753_v43 = vld [vmem:[%s4846_s7 + $0x158] sm:$0xf] }
 0x134   :  { %v3717_v47 = vld [vmem:[%s4846_s7 + $0x118] sm:$0xf]  ;;  %v3725_v52 = vld [vmem:[%s4846_s7 + $0x120] sm:$0xf] }
 0x135   :  { %v1535_v49 = vadd.f32 %v1534_v31, %v1522_v48  ;;  %v1561_v63 = vadd.f32 %v1560_v41, %v1548_v61  ;;  %v3773_v31 = vld [vmem:[%s4846_s7 + $0x188] sm:$0xf]  ;;  %v3747_v41 = vld [vmem:[%s4846_s7 + $0x16c] sm:$0xf0]  ;;  %v3754_v48 = vor.u32 %v4081_v44, %v3753_v43  ;;  %v3577_v44 = vld [vmem:[%s4846_s7] sm:$0xf] }
 0x136   :  { %v3774_v60 = vor.u32 %v4087_v32, %v3773_v31  ;;  %v3750_v46 = vor.u32 %v4077_v40, %v3747_v41  ;;  %v4053_v31 = vld [vmem:[%s4846_s7 + $0x90] sm:$0xf0]  ;;  %v3613_v40 = vld [vmem:[%s4846_s7 + $0x40] sm:$0xf] }
 0x137   :  { %v1631_v51 = vmax.f32 %v1535_v49, 0.0  ;;  %v4073_v49 = vld [vmem:[%s4846_s7 + $0x130] sm:$0xf0]  ;;  %2413 = vmatpush.bf16.msra.mxu0 %v3754_v48  ;;  %v3642_v29 = vor.u32 %v4053_v31, %v3641_v53  ;;  %v3674_v48 = vor.u32 %v4057_v35, %v3671_v37  ;;  %v4076_v53 = vld [vmem:[%s4846_s7 + $0x148] sm:$0xf0] }
 0x138   :  { %2386 = vmatpush.bf16.msra.mxu1 %v3774_v60  ;;  %v3718_v55 = vor.u32 %v4073_v49, %v3717_v47  ;;  %2400 = vmatpush.bf16.msra.mxu2 %v3750_v46  ;;  %v4045_v60 = vld [vmem:[%s4846_s7 + $0x50] sm:$0xf0]  ;;  %v4035_v46 = vld [vmem:[%s4846_s7 + $0x4] sm:$0xf]  ;;  %v3579_v49 = vld [vmem:[%s4846_s7 + $0x1c] sm:$0xf0]  ;;  %v3742_v31 = vor.u32 %v4076_v53, %v3741_v20 }
 0x139   :  { %v1635_v54 = vpack.c.bf16 %v1631_v51, %v1631_v51  ;;  %v3719_v51 = vld [vmem:[%s4846_s7 + $0x134] sm:$0xf0]  ;;  %v3606_v43 = vor.u32 %v4045_v60, %v3605_v33  ;;  %v3587_v33 = vld [vmem:[%s4846_s7 + $0x24] sm:$0xf0]  ;;  %v3705_v60 = vld [vmem:[%s4846_s7 + $0xf0] sm:$0xf] }
 0x13a   :  { %v1523_v56 = vpop.f32.mrf.mxu3  ;;  %v1549_v58 = vpop.f32.mrf.mxu2  ;;  %v3722_v59 = vor.u32 %v4070_v50, %v3719_v51  ;;  %v3585_v50 = vld [vmem:[%s4846_s7 + $0x8] sm:$0xf]  ;;  %v4039_v51 = vld [vmem:[%s4846_s7 + $0x20] sm:$0xf0] }
 0x13b   :  { %1931 = vmatmul.bf16.vlgmr.msrb.gmra.mxu2 %v1635_v54  ;;  %v4074_v54 = vld [vmem:[%s4846_s7 + $0x138] sm:$0xf0]  ;;  %v3689_v56 = vld [vmem:[%s4846_s7 + $0xe0] sm:$0xf] }
 0x13c   :  { %2387 = vmatpush.bf16.msra.mxu1 %v3746_v42  ;;  %v4066_v58 = vld [vmem:[%s4846_s7 + $0xf8] sm:$0xf0]  ;;  %v3726_v61 = vor.u32 %v4074_v54, %v3725_v52  ;;  %2401 = vmatpush.bf16.msra.mxu2 %v3722_v59  ;;  %v3789_v54 = vld [vmem:[%s4846_s7 + $0x198] sm:$0xf]  ;;  %v3797_v59 = vld [vmem:[%s4846_s7 + $0x1a0] sm:$0xf] }
 0x13d   :  { %v4046_v42 = vld [vmem:[%s4846_s7 + $0x58] sm:$0xf0] }
 0x13e   :  { %2414 = vmatpush.bf16.msra.mxu0 %v3726_v61  ;;  %v4090_v61 = vld [vmem:[%s4846_s7 + $0x1b8] sm:$0xf0] }
 0x140   :  { %2388 = vmatpush.bf16.msra.mxu1 %v3718_v55  ;;  %v4089_v55 = vld [vmem:[%s4846_s7 + $0x1b0] sm:$0xf0] }
 0x146   :  { %v1573_v62 = vpop.f32.mrf.mxu1 }
 0x147   :  { %v1574_v1 = vadd.f32 %v1573_v62, %v1561_v63  ;;  %v4063_v62 = vld [vmem:[%s4846_s7 + $0xe4] sm:$0xf]  ;;  %v4085_v63 = vld [vmem:[%s4846_s7 + $0x194] sm:$0xf] }
 0x14a   :  { %v1612_v0 = vpop.f32.mrf.mxu0 }
 0x14e   :  { %v1575_v2 = vpop.f32.mrf.mxu1 }
 0x14f   :  { %v3697_v2 = vld [vmem:[%s4846_s7 + $0xe8] sm:$0xf] }
 0x152   :  { %v1586_v3 = vpop.f32.mrf.mxu3  ;;  %v1599_v5 = vpop.f32.mrf.mxu2 }
 0x153   :  { %v1587_v4 = vadd.f32 %v1586_v3, %v1574_v1  ;;  %v1614_v7 = vpop.f32.mrf.mxu0  ;;  %v3691_v1 = vld [vmem:[%s4846_s7 + $0xfc] sm:$0xf0]  ;;  %v4067_v3 = vld [vmem:[%s4846_s7 + $0x100] sm:$0xf0] }
 0x154   :  { %v3661_v7 = vld [vmem:[%s4846_s7 + $0xa8] sm:$0xf] }
 0x155   :  { %v1600_v6 = vadd.f32 %v1599_v5, %v1587_v4  ;;  %v4078_v5 = vld [vmem:[%s4846_s7 + $0x15c] sm:$0xf] }
 0x156   :  { %v1625_v11 = vpop.f32.mrf.mxu1 }
 0x157   :  { %v1613_v8 = vadd.f32 %v1612_v0, %v1600_v6  ;;  %v3783_v0 = vld [vmem:[%s4846_s7 + $0x1ac] sm:$0xf0]  ;;  %v3690_v6 = vor.u32 %v4066_v58, %v3689_v56  ;;  %v4086_v56 = vld [vmem:[%s4846_s7 + $0x19c] sm:$0xf]  ;;  %v3791_v58 = vld [vmem:[%s4846_s7 + $0x1b4] sm:$0xf0] }
 0x158   :  { %v3786_v4 = vor.u32 %v4085_v63, %v3783_v0  ;;  %v4050_v0 = vld [vmem:[%s4846_s7 + $0x7c] sm:$0xf] }
 0x159   :  { %v1626_v12 = vadd.f32 %v1625_v11, %v1613_v8  ;;  %v4059_v8 = vld [vmem:[%s4846_s7 + $0xc0] sm:$0xf0]  ;;  %v3755_v11 = vld [vmem:[%s4846_s7 + $0x174] sm:$0xf0]  ;;  %2389 = vmatpush.bf16.msra.mxu1 %v3690_v6  ;;  %v3794_v6 = vor.u32 %v4086_v56, %v3791_v58 }
 0x15a   :  { %v1588_v13 = vpop.f32.mrf.mxu3  ;;  %v1601_v14 = vpop.f32.mrf.mxu2  ;;  %2425 = vmatpush.bf16.msrb.mxu3 %v3786_v4 }
 0x15b   :  { %v1632_v15 = vmax.f32 %v1626_v12, 0.0  ;;  %v3694_v12 = vor.u32 %v4063_v62, %v3691_v1  ;;  %v3698_v13 = vor.u32 %v4067_v3, %v3697_v2  ;;  %v4056_v14 = vld [vmem:[%s4846_s7 + $0xac] sm:$0xf]  ;;  %v3643_v1 = vld [vmem:[%s4846_s7 + $0x94] sm:$0xf0]  ;;  %v3582_v2 = vor.u32 %v4035_v46, %v3579_v49 }
 0x15c   :  { %v3586_v3 = vor.u32 %v4039_v51, %v3585_v50  ;;  %v3679_v46 = vld [vmem:[%s4846_s7 + $0xd4] sm:$0xf0]  ;;  %v3649_v49 = vld [vmem:[%s4846_s7 + $0x80] sm:$0xf]  ;;  %v4054_v50 = vld [vmem:[%s4846_s7 + $0x98] sm:$0xf0] }
 0x15d   :  { %v1636_v16 = vpack.c.bf16 %v1632_v15, %v1632_v15  ;;  %v3663_v15 = vld [vmem:[%s4846_s7 + $0xc4] sm:$0xf0]  ;;  %2402 = vmatpush.bf16.msra.mxu2 %v3694_v12  ;;  %2415 = vmatpush.bf16.msra.mxu0 %v3698_v13  ;;  %v4082_v12 = vld [vmem:[%s4846_s7 + $0x178] sm:$0xf0]  ;;  %v4079_v13 = vld [vmem:[%s4846_s7 + $0x164] sm:$0xf]  ;;  %v3650_v56 = vor.u32 %v4054_v50, %v3649_v49 }
 0x15e   :  { %v1627_v10 = vpop.f32.mrf.mxu1  ;;  %v3666_v25 = vor.u32 %v4056_v14, %v3663_v15  ;;  %v3763_v14 = vld [vmem:[%s4846_s7 + $0x17c] sm:$0xf0]  ;;  %v3769_v15 = vld [vmem:[%s4846_s7 + $0x168] sm:$0xf]  ;;  %v4051_v51 = vld [vmem:[%s4846_s7 + $0x84] sm:$0xf] }
 0x15f   :  { %1944 = vmatmul.bf16.vlgmr.msrb.gmra.mxu0 %v1636_v16  ;;  %v3669_v16 = vld [vmem:[%s4846_s7 + $0xb0] sm:$0xf]  ;;  %v3758_v10 = vor.u32 %v4078_v5, %v3755_v11  ;;  %v3790_v5 = vor.u32 %v4089_v55, %v3789_v54  ;;  %v3646_v11 = vor.u32 %v4050_v0, %v3643_v1  ;;  %v3657_v54 = vld [vmem:[%s4846_s7 + $0x88] sm:$0xf]  ;;  %v4055_v55 = vld [vmem:[%s4846_s7 + $0xa0] sm:$0xf0] }
 0x160   :  { %v3623_v0 = vld [vmem:[%s4846_s7 + $0x64] sm:$0xf0]  ;;  %v3629_v1 = vld [vmem:[%s4846_s7 + $0x50] sm:$0xf] }
 0x161   :  { %2426 = vmatpush.bf16.msrb.mxu3 %v3758_v10  ;;  %2403 = vmatpush.bf16.msra.mxu2 %v3666_v25  ;;  %v4075_v25 = vld [vmem:[%s4846_s7 + $0x140] sm:$0xf0] }
 0x165   :  { %2404 = vmatpush.bf16.msra.mxu2 %v3638_v39  ;;  %v4068_v39 = vld [vmem:[%s4846_s7 + $0x108] sm:$0xf0] }
 0x166   :  { %v3706_v35 = vor.u32 %v4068_v39, %v3705_v60 }
 0x172   :  { %v1906_v17 = vpop.f32.mrf.mxu3 }
 0x173   :  { %v1907_v57 = vadd.f32 %v4097_v19, %v1906_v17  ;;  %v4060_v17 = vld [vmem:[%s4846_s7 + $0xc8] sm:$0xf0]  ;;  %v3727_v19 = vld [vmem:[%s4846_s7 + $0x13c] sm:$0xf0] }
 0x174   :  { %v3670_v26 = vor.u32 %v4060_v17, %v3669_v16  ;;  %v4083_v16 = vld [vmem:[%s4846_s7 + $0x180] sm:$0xf0] }
 0x176   :  { %2416 = vmatpush.bf16.msra.mxu0 %v3670_v26  ;;  %v4072_v26 = vld [vmem:[%s4846_s7 + $0x12c] sm:$0xf] }
 0x177   :  { %v3738_v9 = vor.u32 %v4072_v26, %v3735_v27 }
 0x17a   :  { %v1908_v18 = vpop.f32.mrf.mxu3  ;;  %2417 = vmatpush.bf16.msra.mxu0 %v3642_v29  ;;  %v4065_v29 = vld [vmem:[%s4846_s7 + $0xf4] sm:$0xf] }
 0x17b   :  { %v4071_v18 = vld [vmem:[%s4846_s7 + $0x124] sm:$0xf] }
 0x17c   :  { %v3730_v24 = vor.u32 %v4071_v18, %v3727_v19  ;;  %v3766_v18 = vor.u32 %v4079_v13, %v3763_v14  ;;  %v3770_v19 = vor.u32 %v4083_v16, %v3769_v15  ;;  %v4041_v13 = vld [vmem:[%s4846_s7 + $0x30] sm:$0xf0] }
 0x17e   :  { %2427 = vmatpush.bf16.msrb.mxu3 %v3730_v24 }
 0x182   :  { %v1919_v21 = vpop.f32.mrf.mxu1  ;;  %2428 = vmatpush.bf16.msrb.mxu3 %v3702_v34 }
 0x183   :  { %v4383_v22 = vadd.f32 %v1919_v21, %v1907_v57  ;;  %v3662_v57 = vor.u32 %v4059_v8, %v3661_v7  ;;  %v3633_v21 = vld [vmem:[%s4846_s7 + $0x70] sm:$0xf]  ;;  %v3761_v7 = vld [vmem:[%s4846_s7 + $0x160] sm:$0xf]  ;;  %v3798_v8 = vor.u32 %v4090_v61, %v3797_v59  ;;  %v3621_v59 = vld [vmem:[%s4846_s7 + $0x48] sm:$0xf]  ;;  %v3658_v61 = vor.u32 %v4055_v55, %v3657_v54 }
 0x184   :  { %v3762_v17 = vor.u32 %v4082_v12, %v3761_v7  ;;  %v4040_v7 = vld [vmem:[%s4846_s7 + $0x28] sm:$0xf0]  ;;  %v3601_v12 = vld [vmem:[%s4846_s7 + $0x18] sm:$0xf] }
 0x185   :  { %2390 = vmatpush.bf16.msra.mxu1 %v3662_v57  ;;  %v4043_v57 = vld [vmem:[%s4846_s7 + $0x44] sm:$0xf]  ;;  %v3602_v16 = vor.u32 %v4041_v13, %v3601_v12 }
 0x186   :  { %2429 = vmatpush.bf16.msrb.mxu3 %v3674_v48  ;;  %v3685_v48 = vld [vmem:[%s4846_s7 + $0xc0] sm:$0xf] }
 0x18a   :  { %v1921_v23 = vpop.f32.mrf.mxu1  ;;  %2430 = vmatpush.bf16.msrb.mxu3 %v3646_v11  ;;  %v3595_v11 = vld [vmem:[%s4846_s7 + $0x2c] sm:$0xf0] }
 0x18b   :  { %v4052_v23 = vld [vmem:[%s4846_s7 + $0x88] sm:$0xf0] }
 0x18c   :  { %v3634_v32 = vor.u32 %v4052_v23, %v3633_v21  ;;  %v3615_v21 = vld [vmem:[%s4846_s7 + $0x5c] sm:$0xf0]  ;;  %v3733_v23 = vld [vmem:[%s4846_s7 + $0x128] sm:$0xf] }
 0x18d   :  { %v3618_v24 = vor.u32 %v4043_v57, %v3615_v21  ;;  %v3734_v28 = vor.u32 %v4075_v25, %v3733_v23 }
 0x18e   :  { %2391 = vmatpush.bf16.msra.mxu1 %v3634_v32  ;;  %v4036_v32 = vld [vmem:[%s4846_s7 + $0xc] sm:$0xf] }
 0x18f   :  { %2431 = vmatpush.bf16.msrb.mxu3 %v3618_v24  ;;  %v3590_v34 = vor.u32 %v4036_v32, %v3587_v33 }
 0x192   :  { %2392 = vmatpush.bf16.msra.mxu1 %v3606_v43  ;;  %v4061_v43 = vld [vmem:[%s4846_s7 + $0xd0] sm:$0xf0] }
 0x193   :  { %2432 = vmatpush.bf16.msrb.mxu3 %v3590_v34  ;;  %v2573_v34 = vlaneseq }
 0x1be   :  { %v4409_v30 = vpop.f32.mrf.mxu2 }
 0x1bf   :  { %v1933_v41 = vadd.f32 %v4409_v30, %v4383_v22  ;;  %v3610_v22 = vor.u32 %v4042_v36, %v3607_v38  ;;  %v3614_v30 = vor.u32 %v4046_v42, %v3613_v40  ;;  %v3707_v36 = vld [vmem:[%s4846_s7 + $0x10c] sm:$0xf0]  ;;  %v3713_v38 = vld [vmem:[%s4846_s7 + $0xf8] sm:$0xf]  ;;  %v4069_v40 = vld [vmem:[%s4846_s7 + $0x110] sm:$0xf0] }
 0x1c0   :  { %v3710_v37 = vor.u32 %v4065_v29, %v3707_v36  ;;  %v3714_v42 = vor.u32 %v4069_v40, %v3713_v38 }
 0x1c1   :  { %2405 = vmatpush.bf16.msra.mxu2 %v3610_v22  ;;  %2418 = vmatpush.bf16.msra.mxu0 %v3614_v30 }
 0x1c5   :  { %2406 = vmatpush.bf16.msra.mxu2 %v3582_v2  ;;  %2419 = vmatpush.bf16.msra.mxu0 %v3586_v3  ;;  %v4048_v2 = vld [vmem:[%s4846_s7 + $0x68] sm:$0xf0] }
 0x1c6   :  { %v1934_v45 = vpop.f32.mrf.mxu2 }
 0x1c7   :  { %v4038_v45 = vld [vmem:[%s4846_s7 + $0x18] sm:$0xf0] }
 0x1c8   :  { %v3578_v63 = vor.u32 %v4038_v45, %v3577_v44  ;;  %v4058_v44 = vld [vmem:[%s4846_s7 + $0xbc] sm:$0xf] }
 0x1c9   :  { %2451 = vmatpush.bf16.msrb.mxu2 %v3794_v6  ;;  %2464 = vmatpush.bf16.msrb.mxu0 %v3798_v8  ;;  %v3682_v22 = vor.u32 %v4058_v44, %v3679_v46  ;;  %v3630_v6 = vor.u32 %v4048_v2, %v3629_v1  ;;  %v4037_v8 = vld [vmem:[%s4846_s7 + $0x14] sm:$0xf] }
 0x1ca   :  { %2393 = vmatpush.bf16.msra.mxu1 %v3578_v63  ;;  %v4044_v63 = vld [vmem:[%s4846_s7 + $0x4c] sm:$0xf]  ;;  %v3598_v15 = vor.u32 %v4037_v8, %v3595_v11 }
 0x1cd   :  { %2452 = vmatpush.bf16.msrb.mxu2 %v3766_v18  ;;  %2465 = vmatpush.bf16.msrb.mxu0 %v3770_v19 }
 0x1ce   :  { %2438 = vmatpush.bf16.msrb.mxu1 %v3790_v5  ;;  %v3593_v5 = vld [vmem:[%s4846_s7 + $0x10] sm:$0xf] }
 0x1cf   :  { %v3594_v14 = vor.u32 %v4040_v7, %v3593_v5 }
 0x1d1   :  { %2453 = vmatpush.bf16.msrb.mxu2 %v3738_v9  ;;  %2466 = vmatpush.bf16.msrb.mxu0 %v3742_v31 }
 0x1d2   :  { %2439 = vmatpush.bf16.msrb.mxu1 %v3762_v17 }
 0x1d5   :  { %2454 = vmatpush.bf16.msrb.mxu2 %v3710_v37  ;;  %2467 = vmatpush.bf16.msrb.mxu0 %v3714_v42 }
 0x1d6   :  { %2440 = vmatpush.bf16.msrb.mxu1 %v3734_v28 }
 0x1d9   :  { %2455 = vmatpush.bf16.msrb.mxu2 %v3682_v22 }
 0x1da   :  { %2441 = vmatpush.bf16.msrb.mxu1 %v3706_v35 }
 0x1dc   :  { %v1945_v47 = vpop.f32.mrf.mxu0 }
 0x1dd   :  { %v1946_v52 = vadd.f32 %v1945_v47, %v1933_v41  ;;  %v3677_v41 = vld [vmem:[%s4846_s7 + $0xb8] sm:$0xf]  ;;  %v4062_v47 = vld [vmem:[%s4846_s7 + $0xd8] sm:$0xf0] }
 0x1de   :  { %v3678_v45 = vor.u32 %v4061_v43, %v3677_v41  ;;  %v3686_v30 = vor.u32 %v4062_v47, %v3685_v48 }
 0x1df   :  { %v1949_v62 = vmax.f32 %v1946_v52, 0.0  ;;  %v3651_v52 = vld [vmem:[%s4846_s7 + $0x9c] sm:$0xf0] }
 0x1e0   :  { %2442 = vmatpush.bf16.msrb.mxu1 %v3678_v45  ;;  %v3654_v58 = vor.u32 %v4051_v51, %v3651_v52  ;;  %2468 = vmatpush.bf16.msrb.mxu0 %v3686_v30 }
 0x1e1   :  { %v1950_v4 = vpack.c.bf16 %v1949_v62, %v1949_v62  ;;  %v4047_v62 = vld [vmem:[%s4846_s7 + $0x60] sm:$0xf0] }
 0x1e2   :  { %2456 = vmatpush.bf16.msrb.mxu2 %v3654_v58  ;;  %v3622_v3 = vor.u32 %v4047_v62, %v3621_v59 }
 0x1e3   :  { %2027 = vmatmul.bf16.vlgmr.msra.gmra.mxu3 %v1950_v4  ;;  %v3626_v4 = vor.u32 %v4044_v63, %v3623_v0 }
 0x1e4   :  { %v1947_v10 = vpop.f32.mrf.mxu0  ;;  %2443 = vmatpush.bf16.msrb.mxu1 %v3650_v56  ;;  %2469 = vmatpush.bf16.msrb.mxu0 %v3658_v61 }
 0x1e5   :  { %v4098_v10 = vld [vmem:[%s4845_s6] ss:$0 sm:$0xff]  ;;  %s4154_s6 = smov [#allocation5]  }
 0x1e6   :  { %2457 = vmatpush.bf16.msrb.mxu2 %v3626_v4  ;;  %s2612_s7 = sshll.u32 %s4154_s6, 4  ;;  %s2613_s7 = int_to_ptr.vmem [resolvable:$true] %s2612_s7 }
 0x1e8   :  { %2444 = vmatpush.bf16.msrb.mxu1 %v3622_v3  ;;  %2470 = vmatpush.bf16.msrb.mxu0 %v3630_v6 }
 0x1ea   :  { %2458 = vmatpush.bf16.msrb.mxu2 %v3598_v15 }
 0x1ec   :  { %2445 = vmatpush.bf16.msrb.mxu1 %v3594_v14  ;;  %2471 = vmatpush.bf16.msrb.mxu0 %v3602_v16 }
 0x266   :  { %v2028_v17 = vpop.f32.mrf.mxu3 }
 0x267   :  { %v2029_v18 = vadd.f32 %v4098_v10, %v2028_v17 }
 0x269   :  { %v2032_v19 = vmax.f32 %v2029_v18, 0.0 }
 0x26b   :  { %v2033_v57 = vpack.c.bf16 %v2032_v19, %v2032_v19 }
 0x26d   :  { %2394 = vmatmul.bf16.vlgmr.msra.gmra.mxu1 %v2033_v57  ;;  %2407 = vmatmul.bf16.vlgmr.msra.gmra.mxu2 %v2033_v57 }
 0x26e   :  { %2420 = vmatmul.bf16.vlgmr.msra.gmra.mxu0 %v2033_v57  ;;  %2433 = vmatmul.bf16.vlgmr.msrb.gmra.mxu3 %v2033_v57  ;;  %v2030_v21 = vpop.f32.mrf.mxu3 }
 0x27d   :  { %2446 = vmatmul.bf16.vlgmr.msrb.gmra.mxu1 %v2033_v57  ;;  %2459 = vmatmul.bf16.vlgmr.msrb.gmra.mxu2 %v2033_v57 }
 0x27e   :  { %2472 = vmatmul.bf16.vlgmr.msrb.gmra.mxu0 %v2033_v57 }
 0x2ea   :  { %v2395_v23 = vpop.f32.mrf.mxu1 }
 0x2eb   :  { %v2421_v24 = vpop.f32.mrf.mxu0 }
 0x2ec   :  { %v2485_v33 = vrot.slane %v2421_v24, 6 }
 0x2f0   :  { %v2408_v25 = vpop.f32.mrf.mxu2 }
 0x2f1   :  { %v2434_v26 = vpop.f32.mrf.mxu3  ;;  %v2484_v9 = vrot.slane %v2408_v25, 7 }
 0x2f2   :  { %v2397_v27 = vpop.f32.mrf.mxu1  ;;  %v2486_v53 = vrot.slane %v2434_v26, 5 }
 0x2f3   :  { %v2423_v28 = vpop.f32.mrf.mxu0  ;;  %v2491_v39 = vsel %vm2490_vm1, %v2395_v23, %v2484_v9  ;;  %v2503_v29 = vsel %vm2502_vm4, %v2395_v23, %v2484_v9  ;;  %v2515_v36 = vsel %vm4850_vm10, %v2395_v23, %v2484_v9  ;;  %v2526_v35 = vsel %vm2504_vm5, %v2395_v23, %v2484_v9 }
 0x2f4   :  { %v2537_v37 = vsel %vm4851_vm14, %v2395_v23, %v2484_v9  ;;  %v2493_v38 = vsel %vm4852_vm12, %v2485_v33, %v2486_v53  ;;  %v2505_v40 = vsel %vm2504_vm5, %v2485_v33, %v2486_v53  ;;  %v2516_v42 = vsel %vm4853_vm3, %v2485_v33, %v2486_v53  ;;  %vm4864_vm12 = vmmov %vm4851_vm14 }
 0x2f5   :  { %v2544_v41 = vsel %vm4854_vm2, %v2395_v23, %v2484_v9  ;;  %v2551_v43 = vsel %vm4855_vm7, %v2395_v23, %v2484_v9  ;;  %v2527_v44 = vsel %vm4856_vm6, %v2485_v33, %v2486_v53  ;;  %v2538_v45 = vsel %vm4857_vm0, %v2485_v33, %v2486_v53 }
 0x2f6   :  { %v2558_v46 = vsel %vm2530_vm8, %v2484_v9, %v2395_v23  ;;  %v2545_v48 = vsel %vm2530_vm8, %v2486_v53, %v2485_v33  ;;  %v2552_v47 = vsel %vm2490_vm1, %v2485_v33, %v2486_v53  ;;  %v2559_v22 = vsel %vm2502_vm4, %v2485_v33, %v2486_v53 }
 0x2f7   :  { %v2495_v30 = vsel %vm2494_vm9, %v2491_v39, %v2493_v38  ;;  %v2507_v49 = vsel %vm2506_vm11, %v2503_v29, %v2505_v40  ;;  %v2518_v50 = vsel %vm4849_vm13, %v2515_v36, %v2516_v42  ;;  %vm4771_vm2 = vcmp.lt.s32.totalorder %v2573_v34, 784 }
 0x2f8   :  { %v2410_v20 = vpop.f32.mrf.mxu2  ;;  %v2529_v54 = vsel %vm4848_vm15, %v2526_v35, %v2527_v44  ;;  %vm4860_vm3 = vcmask 1045508   ;;  %vm4861_vm6 = vcmask 1046533   ;;  %vm4862_vm7 = vcmask 1045504  }
 0x2f9   :  { %v2436_v31 = vpop.f32.mrf.mxu3  ;;  %v2539_v55 = vsel %vm4860_vm3, %v2537_v37, %v2538_v45  ;;  %v2546_v59 = vsel %vm4861_vm6, %v2544_v41, %v2545_v48  ;;  %v2553_v61 = vsel %vm4862_vm7, %v2552_v47, %v2551_v43  ;;  %vm4863_vm10 = vcmask 1046529   ;;  %vm4866_vm15 = vmmov %vm4861_vm6 }
 0x2fa   :  { %v2447_v32 = vpop.f32.mrf.mxu1  ;;  %v2560_v62 = vsel %vm4863_vm10, %v2559_v22, %v2558_v46  ;;  %vm4865_vm14 = vcmask 1045509   ;;  %vm4867_vm6 = vmmov %vm4862_vm7  ;;  %vm4870_vm13 = vcmask 1044481  }
 0x2fb   :  { %v2473_v60 = vpop.f32.mrf.mxu0  ;;  %v2487_v56 = vrot.slane %v2447_v32, 4  ;;  %vm4868_vm7 = vmmov %vm4863_vm10  ;;  %vm4869_vm10 = vcmask 1043456  }
 0x2fc   :  { %v2489_v63 = vrot.slane %v2473_v60, 2 }
 0x300   :  { %v2460_v51 = vpop.f32.mrf.mxu2 }
 0x301   :  { %v2488_v58 = vrot.slane %v2460_v51, 3 }
 0x302   :  { %v2449_v0 = vpop.f32.mrf.mxu1 }
 0x303   :  { %v2497_v1 = vsel %vm4864_vm12, %v2487_v56, %v2488_v58  ;;  %v2509_v2 = vsel %vm4865_vm14, %v2487_v56, %v2488_v58  ;;  %v2520_v3 = vsel %vm4857_vm0, %v2487_v56, %v2488_v58  ;;  %v2531_v4 = vsel %vm2530_vm8, %v2488_v58, %v2487_v56  ;;  %v2475_v5 = vpop.f32.mrf.mxu0 }
 0x304   :  { %v2499_v6 = vsel %vm4860_vm3, %v2497_v1, %v2489_v63  ;;  %v2511_v7 = vsel %vm4866_vm15, %v2509_v2, %v2489_v63  ;;  %v2522_v8 = vsel %vm4867_vm6, %v2489_v63, %v2520_v3  ;;  %v2533_v11 = vsel %vm4868_vm7, %v2489_v63, %v2531_v4 }
 0x305   :  { %v2501_v12 = vsel %vm4869_vm10, %v2495_v30, %v2499_v6  ;;  %v2513_v13 = vsel %vm4870_vm13, %v2507_v49, %v2511_v7  ;;  %vm4871_vm12 = vcmask 1045506   ;;  %vm4872_vm14 = vcmask 1046531   ;;  %vm4874_vm13 = vmmov %vm4869_vm10 }
 0x306   :  { %v2524_v14 = vsel %vm4871_vm12, %v2518_v50, %v2522_v8  ;;  %v2535_v15 = vsel %vm4872_vm14, %v2529_v54, %v2533_v11  ;;  %v2514_v16 = vrot.slane %v2513_v13, 1  ;;  %v2540_v18 = vsel %vm2490_vm1, %v2487_v56, %v2488_v58  ;;  %2577 = vst.msk [vmem:[#allocation5] ss:$2 sm:$0x7f] %vm4771_vm2, %v2501_v12 }
 0x307   :  { %v2525_v10 = vrot.slane %v2524_v14, 2  ;;  %v2536_v17 = vrot.slane %v2535_v15, 3  ;;  %v2541_v19 = vsel %vm2494_vm9, %v2540_v18, %v2489_v63  ;;  %v2547_v57 = vsel %vm2502_vm4, %v2487_v56, %v2488_v58  ;;  %2593 = vst.msk [vmem:[#allocation5 + $0x1] ss:$2 sm:$0x7f] %vm4771_vm2, %v2501_v12  ;;  %vm4878_vm9 = vmmov %vm4871_vm12 }
 0x308   :  { %vm4873_vm8 = vcmask 1042434   ;;  %v2561_v23 = vsel %vm2504_vm5, %v2487_v56, %v2488_v58  ;;  %v2542_v24 = vsel %vm4874_vm13, %v2541_v19, %v2539_v55  ;;  %v2548_v25 = vsel %vm2506_vm11, %v2547_v57, %v2489_v63  ;;  %2579 = vst.msk [vmem:[#allocation5 + $0xe] ss:$2 sm:$0x7f] %vm4771_vm2, %v2514_v16  ;;  %v2462_v28 = vpop.f32.mrf.mxu2  ;;  %vm4879_vm5 = vmmov %vm4872_vm14 }
 0x309   :  { %v2554_v21 = vsel %vm4873_vm8, %v2487_v56, %v2488_v58  ;;  %vm4875_vm15 = vcmask 1043458   ;;  %vm4876_vm1 = vcmask 1044483   ;;  %v2543_v9 = vrot.slane %v2542_v24, 4  ;;  %2581 = vst.msk [vmem:[#allocation5 + $0x1c] ss:$2 sm:$0x7f] %vm4771_vm2, %v2525_v10 }
 0x30a   :  { %v2555_v26 = vsel %vm4875_vm15, %v2554_v21, %v2489_v63  ;;  %v2562_v27 = vsel %vm4876_vm1, %v2561_v23, %v2489_v63  ;;  %vm4877_vm4 = vcmask 1044481   ;;  %2583 = vst.msk [vmem:[#allocation5 + $0x2a] ss:$2 sm:$0x7f] %vm4771_vm2, %v2536_v17 }
 0x30b   :  { %v2549_v20 = vsel %vm4877_vm4, %v2548_v25, %v2546_v59  ;;  %v2556_v53 = vsel %vm4878_vm9, %v2555_v26, %v2553_v61  ;;  %v2563_v31 = vsel %vm4879_vm5, %v2562_v27, %v2560_v62  ;;  %2585 = vst.msk [vmem:[#allocation5 + $0x38] ss:$2 sm:$0x7f] %vm4771_vm2, %v2543_v9 }
 0x30c   :  { %v2550_v32 = vrot.slane %v2549_v20, 5  ;;  %v2557_v33 = vrot.slane %v2556_v53, 6  ;;  %v2564_v60 = vrot.slane %v2563_v31, 7  ;;  %2595 = vst.msk [vmem:[#allocation5 + $0xf] ss:$2 sm:$0x7f] %vm4771_vm2, %v2514_v16 }
 0x30d   :  { %2597 = vst.msk [vmem:[#allocation5 + $0x1d] ss:$2 sm:$0x7f] %vm4771_vm2, %v2525_v10 }
 0x30e   :  { %2587 = vst.msk [vmem:[#allocation5 + $0x46] ss:$2 sm:$0x7f] %vm4771_vm2, %v2550_v32 }
 0x30f   :  { %2589 = vst.msk [vmem:[#allocation5 + $0x54] ss:$2 sm:$0x7f] %vm4771_vm2, %v2557_v33 }
 0x310   :  { %2591 = vst.msk [vmem:[#allocation5 + $0x62] ss:$2 sm:$0x7f] %vm4771_vm2, %v2564_v60 }
 0x311   :  { %2599 = vst.msk [vmem:[#allocation5 + $0x2b] ss:$2 sm:$0x7f] %vm4771_vm2, %v2536_v17 }
 0x312   :  { %2601 = vst.msk [vmem:[#allocation5 + $0x39] ss:$2 sm:$0x7f] %vm4771_vm2, %v2543_v9 }
 0x313   :  { %2603 = vst.msk [vmem:[#allocation5 + $0x47] ss:$2 sm:$0x7f] %vm4771_vm2, %v2550_v32 }
 0x314   :  { %2605 = vst.msk [vmem:[#allocation5 + $0x55] ss:$2 sm:$0x7f] %vm4771_vm2, %v2557_v33 }
 0x315   :  { %2607 = vst.msk [vmem:[#allocation5 + $0x63] ss:$2 sm:$0x7f] %vm4771_vm2, %v2564_v60 }
 0x316   :  { %2620 = dma.vmem_to_hbm [thread:$0]  %s2613_s7, 1792, %s2615_s28, [#allocation4], %s4155_s8, %s4155_s8, %s4156_s29  }
 0x317   :  { %4149 = dma.done.wait [#allocation4], 1792  }
 0x318   :  { %4150 = vsyncadd [#allocation4], 4294965504 }
 0x319   :  { %2625 = vsyncpa [#allocation3], 1 }
 0x31a   :  { %2626 = vsyncpa [#allocation4], 1 }

</bundles_post_ra>
